<compile_context>
chip_gen: v7x
topology: tpu7x:2x2x1
jax: 0.10.0
libtpu: 0.0.40
codegen_flags: <defaults>
</compile_context>

<pallas_src>
import functools

import jax
import jax.numpy as jnp
from jax import lax
from jax.experimental import pallas as pl
from jax.experimental.pallas import tpu as pltpu

NUM_GROUPS = 8
KSIZE = 3
EPS = 1e-5


def _shifted_taps(v, masks, w, pad):
    """Nine 3x3 taps of `v` stacked along the K/sublane axis -> (9*Cin, L).

    `v` is (Cin, L) with L = B*H*W flattened pixels (sample-major) on lanes.
    A shift by dy*w+dx in the flattened index gives the (y+dy, x+dx) source
    pixel; positions that would cross an image border (or a sample boundary)
    are zeroed by the precomputed per-tap masks.
    """
    cq, l = v.shape
    zcol = jnp.zeros((cq, pad), v.dtype)
    vp = jnp.concatenate([zcol, v, zcol], axis=1)          # (Cin, L + 2*pad)
    pieces = []
    t = 0
    for dy in (-1, 0, 1):
        for dx in (-1, 0, 1):
            off = dy * w + dx
            if off == 0:
                tap = v                                    # centre tap
            else:
                tap = vp[:, pad + off:pad + off + l] * masks[t:t + 1, :]
            pieces.append(tap)
            t += 1
    # Sublane-aligned concat: each piece has Cin (8/16) rows.
    return jnp.concatenate(pieces, axis=0)                 # (9*Cin, L)


def _group_norm(v, omb, obm, a_mat, gamma, beta, cg, m_pix):
    """Batched GroupNorm on v (Cq, L): channels on sublanes, pixels on lanes.

    Per-sample reductions / broadcasts are matmuls against the block-of-ones
    matrices omb (L, B) and obm (B, L); `a_mat` (Cq, Cq) sums channels within
    a group and is skipped when cg == 1.  Variance uses centred values.
    """
    inv_n = 1.0 / float(cg * m_pix)
    s1 = jnp.dot(v, omb, preferred_element_type=jnp.float32)        # (Cq, B)
    if cg > 1:
        s1 = jnp.dot(a_mat, s1, preferred_element_type=jnp.float32)
    mean = s1 * inv_n                                                # (Cq, B)
    d = v - jnp.dot(mean, obm, preferred_element_type=jnp.float32)   # (Cq, L)
    s2 = jnp.dot(d * d, omb, preferred_element_type=jnp.float32)     # (Cq, B)
    if cg > 1:
        s2 = jnp.dot(a_mat, s2, preferred_element_type=jnp.float32)
    inv = lax.rsqrt(s2 * inv_n + EPS)                                # (Cq, B)
    scale = jnp.dot(inv * gamma, obm,
                    preferred_element_type=jnp.float32)              # (Cq, L)
    return d * scale + beta


def resnet_layer_kernel(z_ref, x_ref, w1_ref, w2_ref, a1_ref, a2_ref,
                        mask_ref, omb_ref, obm_ref,
                        g1_ref, b1_ref, g2_ref, b2_ref, g3_ref, b3_ref,
                        out_ref, *, h, w):
    c_out = z_ref.shape[0]
    c_in = w1_ref.shape[0]
    m_pix = h * w
    pad = w + 1
    cg1 = c_in // NUM_GROUPS
    cg2 = c_out // NUM_GROUPS

    z = z_ref[...]                       # (C,  L)
    x = x_ref[...]                       # (C,  L)
    masks = mask_ref[...]                # (9,  L)
    omb = omb_ref[...]                   # (L,  B)
    obm = obm_ref[...]                   # (B,  L)

    # ---- conv1(z) + relu: one (Ci, 9C) @ (9C, L) matmul ----
    p1 = _shifted_taps(z, masks, w, pad)
    h1 = jnp.maximum(
        jnp.dot(w1_ref[...], p1, preferred_element_type=jnp.float32), 0.0)

    # ---- y = GroupNorm1(relu(conv1(z))) ----
    y = _group_norm(h1, omb, obm, a1_ref[...], g1_ref[...], b1_ref[...],
                    cg1, m_pix)

    # ---- conv2(y): one (C, 9Ci) @ (9Ci, L) matmul ----
    p2 = _shifted_taps(y, masks, w, pad)
    c2 = jnp.dot(w2_ref[...], p2, preferred_element_type=jnp.float32)

    # ---- out = GroupNorm3(relu(z + GroupNorm2(x + conv2(y)))) ----
    t2 = _group_norm(x + c2, omb, obm, a2_ref[...], g2_ref[...], b2_ref[...],
                     cg2, m_pix)
    t3 = jnp.maximum(z + t2, 0.0)
    out_ref[...] = _group_norm(t3, omb, obm, a2_ref[...], g3_ref[...],
                               b3_ref[...], cg2, m_pix)


def _pick_batch_block(n, cap=16):
    """Largest divisor of n <= cap, preferring >= 2 grid steps (v7x cores)."""
    divisors = [b for b in range(1, n + 1) if n % b == 0 and b <= cap]
    multi_step = [b for b in divisors if n // b >= 2]
    return max(multi_step) if multi_step else max(divisors)


@jax.jit
def resnet_layer_forward(z_nchw, x_nchw, w1_oihw, w2_oihw,
                         g1, b1, g2, b2, g3, b3):
    """PyTorch-equivalent ResNetLayer forward. Inputs/outputs are NCHW."""
    f32 = jnp.float32
    N, C, H, W = z_nchw.shape
    Ci = w1_oihw.shape[0]
    M = H * W

    B = _pick_batch_block(N)
    L = B * M

    # --- layout plumbing (pure XLA, outside the kernel) ---
    z_t = jnp.transpose(z_nchw.astype(f32).reshape(N, C, M),
                        (1, 0, 2)).reshape(C, N * M)
    x_t = jnp.transpose(x_nchw.astype(f32).reshape(N, C, M),
                        (1, 0, 2)).reshape(C, N * M)

    # im2col weights: OIHW -> (O, kh, kw, I) -> (O, 9*I); K index = tap*Cin+i.
    w1f = jnp.transpose(w1_oihw, (0, 2, 3, 1)).reshape(
        Ci, KSIZE * KSIZE * C).astype(f32)
    w2f = jnp.transpose(w2_oihw, (0, 2, 3, 1)).reshape(
        C, KSIZE * KSIZE * Ci).astype(f32)

    # Within-group channel summing matrices.
    def group_sum_matrix(nc):
        gi = jnp.arange(nc) // (nc // NUM_GROUPS)
        return (gi[:, None] == gi[None, :]).astype(f32)
    a1 = group_sum_matrix(Ci)                    # (Ci, Ci) for norm1
    a2 = group_sum_matrix(C)                     # (C, C)   for norm2/3

    # Per-tap border-validity masks over flattened pixels, tiled per sample.
    ys = jnp.arange(H)[:, None]
    xs = jnp.arange(W)[None, :]
    rows = []
    for dy in (-1, 0, 1):
        for dx in (-1, 0, 1):
            valid = ((ys + dy >= 0) & (ys + dy < H) &
                     (xs + dx >= 0) & (xs + dx < W))
            rows.append(valid.reshape(1, M))
    masks = jnp.tile(jnp.concatenate(rows, axis=0).astype(f32), (1, B))

    # Block-of-ones matrices for per-sample GN reductions / broadcasts.
    sample_id = jnp.repeat(jnp.arange(B), M)                     # (L,)
    omb = (sample_id[:, None] == jnp.arange(B)[None, :]).astype(f32)  # (L, B)
    obm = jnp.transpose(omb)                                          # (B, L)

    g1r, b1r = g1.reshape(Ci, 1).astype(f32), b1.reshape(Ci, 1).astype(f32)
    g2r, b2r = g2.reshape(C, 1).astype(f32), b2.reshape(C, 1).astype(f32)
    g3r, b3r = g3.reshape(C, 1).astype(f32), b3.reshape(C, 1).astype(f32)

    kern = functools.partial(resnet_layer_kernel, h=H, w=W)
    blk = lambda n: (0, n)
    cst = lambda n: (0, 0)

    out_t = pl.pallas_call(
        kern,
        out_shape=jax.ShapeDtypeStruct((C, N * M), f32),
        grid=(N // B,),
        in_specs=[
            pl.BlockSpec((C, L), blk),                       # z (transposed)
            pl.BlockSpec((C, L), blk),                       # x (transposed)
            pl.BlockSpec((Ci, KSIZE * KSIZE * C), cst),      # w1 (im2col)
            pl.BlockSpec((C, KSIZE * KSIZE * Ci), cst),      # w2 (im2col)
            pl.BlockSpec((Ci, Ci), cst),                     # group-sum norm1
            pl.BlockSpec((C, C), cst),                       # group-sum norm2/3
            pl.BlockSpec((KSIZE * KSIZE, L), cst),           # tap masks
            pl.BlockSpec((L, B), cst),                       # ones (L, B)
            pl.BlockSpec((B, L), cst),                       # ones (B, L)
            pl.BlockSpec((Ci, 1), cst), pl.BlockSpec((Ci, 1), cst),
            pl.BlockSpec((C, 1), cst), pl.BlockSpec((C, 1), cst),
            pl.BlockSpec((C, 1), cst), pl.BlockSpec((C, 1), cst),
        ],
        out_specs=pl.BlockSpec((C, L), blk),
        compiler_params=pltpu.CompilerParams(
            dimension_semantics=("parallel",),
            vmem_limit_bytes=48 * 1024 * 1024),
    )(z_t, x_t, w1f, w2f, a1, a2, masks, omb, obm,
      g1r, b1r, g2r, b2r, g3r, b3r)

    # (C, N*M) -> NCHW (wrapper-side layout plumbing).
    return jnp.transpose(out_t.reshape(C, N, M), (1, 0, 2)).reshape(N, C, H, W)


# ---------------- pure-JAX reference (for correctness check) ----------------
def _conv2d_same(x, w):  # x: NCHW, w: OIHW
    return lax.conv_general_dilated(
        x, w, window_strides=(1, 1), padding="SAME",
        dimension_numbers=("NCHW", "OIHW", "NCHW"))


def _gn_ref(x, num_groups, gamma, beta, eps=EPS):
    N, C, H, W = x.shape
    xg = x.reshape(N, num_groups, C // num_groups, H, W)
    mean = xg.mean(axis=(2, 3, 4), keepdims=True)
    var = ((xg - mean) ** 2).mean(axis=(2, 3, 4), keepdims=True)
    xn = ((xg - mean) / jnp.sqrt(var + eps)).reshape(N, C, H, W)
    return xn * gamma[None, :, None, None] + beta[None, :, None, None]


def reference_forward(z, x, w1, w2, g1, b1, g2, b2, g3, b3):
    y = _gn_ref(jax.nn.relu(_conv2d_same(z, w1)), NUM_GROUPS, g1, b1)
    inner = _gn_ref(x + _conv2d_same(y, w2), NUM_GROUPS, g2, b2)
    return _gn_ref(jax.nn.relu(z + inner), NUM_GROUPS, g3, b3)


if __name__ == "__main__":
    # n_channels=8, n_inner_channels=16 (num_groups=8 requires C % 8 == 0).
    N, C, Ci, H, W = 4, 8, 16, 16, 16

    key = jax.random.PRNGKey(0)
    kz, kx, k1, k2 = jax.random.split(key, 4)
    z = jax.random.normal(kz, (N, C, H, W), jnp.float32)
    x = jax.random.normal(kx, (N, C, H, W), jnp.float32)

    # conv weights ~ N(0, 0.01), bias=False (matches module __init__)
    w1 = 0.01 * jax.random.normal(k1, (Ci, C, KSIZE, KSIZE), jnp.float32)
    w2 = 0.01 * jax.random.normal(k2, (C, Ci, KSIZE, KSIZE), jnp.float32)
    # GroupNorm affine params at PyTorch defaults (weight=1, bias=0)
    g1, b1 = jnp.ones((Ci,), jnp.float32), jnp.zeros((Ci,), jnp.float32)
    g2, b2 = jnp.ones((C,), jnp.float32), jnp.zeros((C,), jnp.float32)
    g3, b3 = jnp.ones((C,), jnp.float32), jnp.zeros((C,), jnp.float32)

    out = resnet_layer_forward(z, x, w1, w2, g1, b1, g2, b2, g3, b3)
    out = jax.block_until_ready(out)

    ref = reference_forward(z, x, w1, w2, g1, b1, g2, b2, g3, b3)
    assert out.shape == (N, C, H, W)
    err = float(jnp.max(jnp.abs(out - ref)))
    assert jnp.allclose(out, ref, atol=1e-4, rtol=1e-4), err
    print("KERNEL_OK")
</pallas_src>

<mosaic_0001>
module attributes {stable_mosaic.version = 11 : i64} {
  func.func @resnet_layer_kernel(%arg0: i32, %arg1: memref<8x512xf32, #tpu.memory_space<vmem>>, %arg2: memref<8x512xf32, #tpu.memory_space<vmem>>, %arg3: memref<16x72xf32, #tpu.memory_space<vmem>>, %arg4: memref<8x144xf32, #tpu.memory_space<vmem>>, %arg5: memref<16x16xf32, #tpu.memory_space<vmem>>, %arg6: memref<8x8xf32, #tpu.memory_space<vmem>>, %arg7: memref<9x512xf32, #tpu.memory_space<vmem>>, %arg8: memref<512x2xf32, #tpu.memory_space<vmem>>, %arg9: memref<2x512xf32, #tpu.memory_space<vmem>>, %arg10: memref<16x1xf32, #tpu.memory_space<vmem>>, %arg11: memref<16x1xf32, #tpu.memory_space<vmem>>, %arg12: memref<8x1xf32, #tpu.memory_space<vmem>>, %arg13: memref<8x1xf32, #tpu.memory_space<vmem>>, %arg14: memref<8x1xf32, #tpu.memory_space<vmem>>, %arg15: memref<8x1xf32, #tpu.memory_space<vmem>>, %arg16: memref<8x512xf32, #tpu.memory_space<vmem>>) attributes {dimension_semantics = [#tpu.dimension_semantics<parallel>], iteration_bounds = array<i64: 2>, scalar_prefetch = 0 : i64, scratch_operands = 0 : i64, tpu.core_type = #tpu.core_type<tc>, window_params = [{transform_indices = @transform_0, window_bounds = array<i64: 8, 512>}, {transform_indices = @transform_1, window_bounds = array<i64: 8, 512>}, {pipeline_mode = #tpu.pipeline_mode<synchronous>, transform_indices = @transform_2, window_bounds = array<i64: 16, 72>}, {pipeline_mode = #tpu.pipeline_mode<synchronous>, transform_indices = @transform_3, window_bounds = array<i64: 8, 144>}, {pipeline_mode = #tpu.pipeline_mode<synchronous>, transform_indices = @transform_4, window_bounds = array<i64: 16, 16>}, {pipeline_mode = #tpu.pipeline_mode<synchronous>, transform_indices = @transform_5, window_bounds = array<i64: 8, 8>}, {pipeline_mode = #tpu.pipeline_mode<synchronous>, transform_indices = @transform_6, window_bounds = array<i64: 9, 512>}, {pipeline_mode = #tpu.pipeline_mode<synchronous>, transform_indices = @transform_7, window_bounds = array<i64: 512, 2>}, {pipeline_mode = #tpu.pipeline_mode<synchronous>, transform_indices = @transform_8, window_bounds = array<i64: 2, 512>}, {pipeline_mode = #tpu.pipeline_mode<synchronous>, transform_indices = @transform_9, window_bounds = array<i64: 16, 1>}, {pipeline_mode = #tpu.pipeline_mode<synchronous>, transform_indices = @transform_10, window_bounds = array<i64: 16, 1>}, {pipeline_mode = #tpu.pipeline_mode<synchronous>, transform_indices = @transform_11, window_bounds = array<i64: 8, 1>}, {pipeline_mode = #tpu.pipeline_mode<synchronous>, transform_indices = @transform_12, window_bounds = array<i64: 8, 1>}, {pipeline_mode = #tpu.pipeline_mode<synchronous>, transform_indices = @transform_13, window_bounds = array<i64: 8, 1>}, {pipeline_mode = #tpu.pipeline_mode<synchronous>, transform_indices = @transform_14, window_bounds = array<i64: 8, 1>}, {transform_indices = @transform_15, window_bounds = array<i64: 8, 512>}]} {
    %c0 = arith.constant 0 : index
    %c0_0 = arith.constant 0 : index
    %0 = vector.load %arg1[%c0, %c0_0] : memref<8x512xf32, #tpu.memory_space<vmem>>, vector<8x512xf32>
    %c0_1 = arith.constant 0 : index
    %c0_2 = arith.constant 0 : index
    %1 = vector.load %arg2[%c0_1, %c0_2] : memref<8x512xf32, #tpu.memory_space<vmem>>, vector<8x512xf32>
    %c0_3 = arith.constant 0 : index
    %c0_4 = arith.constant 0 : index
    %2 = vector.load %arg7[%c0_3, %c0_4] : memref<9x512xf32, #tpu.memory_space<vmem>>, vector<9x512xf32>
    %c0_5 = arith.constant 0 : index
    %c0_6 = arith.constant 0 : index
    %3 = vector.load %arg8[%c0_5, %c0_6] : memref<512x2xf32, #tpu.memory_space<vmem>>, vector<512x2xf32>
    %c0_7 = arith.constant 0 : index
    %c0_8 = arith.constant 0 : index
    %4 = vector.load %arg9[%c0_7, %c0_8] : memref<2x512xf32, #tpu.memory_space<vmem>>, vector<2x512xf32>
    %cst = arith.constant 0.000000e+00 : f32
    %5 = vector.broadcast %cst : f32 to vector<8x17xf32>
    %6 = tpu.concatenate %5, %0, %5 in 1 : vector<8x17xf32>, vector<8x512xf32>, vector<8x17xf32> -> vector<8x546xf32>
    %7 = vector.extract_strided_slice %6 {offsets = [0, 0], sizes = [8, 512], strides = [1, 1]} : vector<8x546xf32> to vector<8x512xf32>
    %8 = vector.extract_strided_slice %2 {offsets = [0, 0], sizes = [1, 512], strides = [1, 1]} : vector<9x512xf32> to vector<1x512xf32>
    %9 = vector.broadcast %8 : vector<1x512xf32> to vector<8x512xf32>
    %10 = arith.mulf %7, %9 : vector<8x512xf32>
    %11 = vector.extract_strided_slice %6 {offsets = [0, 1], sizes = [8, 512], strides = [1, 1]} : vector<8x546xf32> to vector<8x512xf32>
    %12 = vector.extract_strided_slice %2 {offsets = [1, 0], sizes = [1, 512], strides = [1, 1]} : vector<9x512xf32> to vector<1x512xf32>
    %13 = vector.broadcast %12 : vector<1x512xf32> to vector<8x512xf32>
    %14 = arith.mulf %11, %13 : vector<8x512xf32>
    %15 = vector.extract_strided_slice %6 {offsets = [0, 2], sizes = [8, 512], strides = [1, 1]} : vector<8x546xf32> to vector<8x512xf32>
    %16 = vector.extract_strided_slice %2 {offsets = [2, 0], sizes = [1, 512], strides = [1, 1]} : vector<9x512xf32> to vector<1x512xf32>
    %17 = vector.broadcast %16 : vector<1x512xf32> to vector<8x512xf32>
    %18 = arith.mulf %15, %17 : vector<8x512xf32>
    %19 = vector.extract_strided_slice %6 {offsets = [0, 16], sizes = [8, 512], strides = [1, 1]} : vector<8x546xf32> to vector<8x512xf32>
    %20 = vector.extract_strided_slice %2 {offsets = [3, 0], sizes = [1, 512], strides = [1, 1]} : vector<9x512xf32> to vector<1x512xf32>
    %21 = vector.broadcast %20 : vector<1x512xf32> to vector<8x512xf32>
    %22 = arith.mulf %19, %21 : vector<8x512xf32>
    %23 = vector.extract_strided_slice %6 {offsets = [0, 18], sizes = [8, 512], strides = [1, 1]} : vector<8x546xf32> to vector<8x512xf32>
    %24 = vector.extract_strided_slice %2 {offsets = [5, 0], sizes = [1, 512], strides = [1, 1]} : vector<9x512xf32> to vector<1x512xf32>
    %25 = vector.broadcast %24 : vector<1x512xf32> to vector<8x512xf32>
    %26 = arith.mulf %23, %25 : vector<8x512xf32>
    %27 = vector.extract_strided_slice %6 {offsets = [0, 32], sizes = [8, 512], strides = [1, 1]} : vector<8x546xf32> to vector<8x512xf32>
    %28 = vector.extract_strided_slice %2 {offsets = [6, 0], sizes = [1, 512], strides = [1, 1]} : vector<9x512xf32> to vector<1x512xf32>
    %29 = vector.broadcast %28 : vector<1x512xf32> to vector<8x512xf32>
    %30 = arith.mulf %27, %29 : vector<8x512xf32>
    %31 = vector.extract_strided_slice %6 {offsets = [0, 33], sizes = [8, 512], strides = [1, 1]} : vector<8x546xf32> to vector<8x512xf32>
    %32 = vector.extract_strided_slice %2 {offsets = [7, 0], sizes = [1, 512], strides = [1, 1]} : vector<9x512xf32> to vector<1x512xf32>
    %33 = vector.broadcast %32 : vector<1x512xf32> to vector<8x512xf32>
    %34 = arith.mulf %31, %33 : vector<8x512xf32>
    %35 = vector.extract_strided_slice %6 {offsets = [0, 34], sizes = [8, 512], strides = [1, 1]} : vector<8x546xf32> to vector<8x512xf32>
    %36 = vector.extract_strided_slice %2 {offsets = [8, 0], sizes = [1, 512], strides = [1, 1]} : vector<9x512xf32> to vector<1x512xf32>
    %37 = vector.broadcast %36 : vector<1x512xf32> to vector<8x512xf32>
    %38 = arith.mulf %35, %37 : vector<8x512xf32>
    %39 = tpu.concatenate %10, %14, %18, %22, %0, %26, %30, %34, %38 in 0 : vector<8x512xf32>, vector<8x512xf32>, vector<8x512xf32>, vector<8x512xf32>, vector<8x512xf32>, vector<8x512xf32>, vector<8x512xf32>, vector<8x512xf32>, vector<8x512xf32> -> vector<72x512xf32>
    %c0_9 = arith.constant 0 : index
    %c0_10 = arith.constant 0 : index
    %40 = vector.load %arg3[%c0_9, %c0_10] : memref<16x72xf32, #tpu.memory_space<vmem>>, vector<16x72xf32>
    %cst_11 = arith.constant dense<0.000000e+00> : vector<16x512xf32>
    %41 = tpu.matmul %40, %39, %cst_11 {dimension_numbers = #tpu.dot_dimension_numbers<[1], [0], [0], [1], [0, 0, 1, 1], [], []>} : vector<16x72xf32>, vector<72x512xf32>, vector<16x512xf32> -> vector<16x512xf32>
    %cst_12 = arith.constant 0.000000e+00 : f32
    %42 = vector.broadcast %cst_12 : f32 to vector<16x512xf32>
    %43 = arith.maximumf %41, %42 : vector<16x512xf32>
    %c0_13 = arith.constant 0 : index
    %c0_14 = arith.constant 0 : index
    %44 = vector.load %arg5[%c0_13, %c0_14] : memref<16x16xf32, #tpu.memory_space<vmem>>, vector<16x16xf32>
    %c0_15 = arith.constant 0 : index
    %c0_16 = arith.constant 0 : index
    %45 = vector.load %arg10[%c0_15, %c0_16] : memref<16x1xf32, #tpu.memory_space<vmem>>, vector<16x1xf32>
    %c0_17 = arith.constant 0 : index
    %c0_18 = arith.constant 0 : index
    %46 = vector.load %arg11[%c0_17, %c0_18] : memref<16x1xf32, #tpu.memory_space<vmem>>, vector<16x1xf32>
    %cst_19 = arith.constant dense<0.000000e+00> : vector<16x2xf32>
    %47 = tpu.matmul %43, %3, %cst_19 {dimension_numbers = #tpu.dot_dimension_numbers<[1], [0], [0], [1], [0, 0, 1, 1], [], []>} : vector<16x512xf32>, vector<512x2xf32>, vector<16x2xf32> -> vector<16x2xf32>
    %cst_20 = arith.constant dense<0.000000e+00> : vector<16x2xf32>
    %48 = tpu.matmul %44, %47, %cst_20 {dimension_numbers = #tpu.dot_dimension_numbers<[1], [0], [0], [1], [0, 0, 1, 1], [], []>} : vector<16x16xf32>, vector<16x2xf32>, vector<16x2xf32> -> vector<16x2xf32>
    %cst_21 = arith.constant 0.001953125 : f32
    %49 = vector.broadcast %cst_21 : f32 to vector<16x2xf32>
    %50 = arith.mulf %48, %49 : vector<16x2xf32>
    %cst_22 = arith.constant dense<0.000000e+00> : vector<16x512xf32>
    %51 = tpu.matmul %50, %4, %cst_22 {dimension_numbers = #tpu.dot_dimension_numbers<[1], [0], [0], [1], [0, 0, 1, 1], [], []>} : vector<16x2xf32>, vector<2x512xf32>, vector<16x512xf32> -> vector<16x512xf32>
    %52 = arith.subf %43, %51 : vector<16x512xf32>
    %53 = arith.mulf %52, %52 : vector<16x512xf32>
    %cst_23 = arith.constant dense<0.000000e+00> : vector<16x2xf32>
    %54 = tpu.matmul %53, %3, %cst_23 {dimension_numbers = #tpu.dot_dimension_numbers<[1], [0], [0], [1], [0, 0, 1, 1], [], []>} : vector<16x512xf32>, vector<512x2xf32>, vector<16x2xf32> -> vector<16x2xf32>
    %cst_24 = arith.constant dense<0.000000e+00> : vector<16x2xf32>
    %55 = tpu.matmul %44, %54, %cst_24 {dimension_numbers = #tpu.dot_dimension_numbers<[1], [0], [0], [1], [0, 0, 1, 1], [], []>} : vector<16x16xf32>, vector<16x2xf32>, vector<16x2xf32> -> vector<16x2xf32>
    %cst_25 = arith.constant 0.001953125 : f32
    %56 = vector.broadcast %cst_25 : f32 to vector<16x2xf32>
    %57 = arith.mulf %55, %56 : vector<16x2xf32>
    %cst_26 = arith.constant 9.99999974E-6 : f32
    %58 = vector.broadcast %cst_26 : f32 to vector<16x2xf32>
    %59 = arith.addf %57, %58 : vector<16x2xf32>
    %60 = math.rsqrt %59 : vector<16x2xf32>
    %61 = vector.broadcast %45 : vector<16x1xf32> to vector<16x2xf32>
    %62 = arith.mulf %60, %61 : vector<16x2xf32>
    %cst_27 = arith.constant dense<0.000000e+00> : vector<16x512xf32>
    %63 = tpu.matmul %62, %4, %cst_27 {dimension_numbers = #tpu.dot_dimension_numbers<[1], [0], [0], [1], [0, 0, 1, 1], [], []>} : vector<16x2xf32>, vector<2x512xf32>, vector<16x512xf32> -> vector<16x512xf32>
    %64 = arith.mulf %52, %63 : vector<16x512xf32>
    %65 = vector.broadcast %46 : vector<16x1xf32> to vector<16x512xf32>
    %66 = arith.addf %64, %65 : vector<16x512xf32>
    %cst_28 = arith.constant 0.000000e+00 : f32
    %67 = vector.broadcast %cst_28 : f32 to vector<16x17xf32>
    %68 = tpu.concatenate %67, %66, %67 in 1 : vector<16x17xf32>, vector<16x512xf32>, vector<16x17xf32> -> vector<16x546xf32>
    %69 = vector.extract_strided_slice %68 {offsets = [0, 0], sizes = [16, 512], strides = [1, 1]} : vector<16x546xf32> to vector<16x512xf32>
    %70 = vector.extract_strided_slice %2 {offsets = [0, 0], sizes = [1, 512], strides = [1, 1]} : vector<9x512xf32> to vector<1x512xf32>
    %71 = vector.broadcast %70 : vector<1x512xf32> to vector<16x512xf32>
    %72 = arith.mulf %69, %71 : vector<16x512xf32>
    %73 = vector.extract_strided_slice %68 {offsets = [0, 1], sizes = [16, 512], strides = [1, 1]} : vector<16x546xf32> to vector<16x512xf32>
    %74 = vector.extract_strided_slice %2 {offsets = [1, 0], sizes = [1, 512], strides = [1, 1]} : vector<9x512xf32> to vector<1x512xf32>
    %75 = vector.broadcast %74 : vector<1x512xf32> to vector<16x512xf32>
    %76 = arith.mulf %73, %75 : vector<16x512xf32>
    %77 = vector.extract_strided_slice %68 {offsets = [0, 2], sizes = [16, 512], strides = [1, 1]} : vector<16x546xf32> to vector<16x512xf32>
    %78 = vector.extract_strided_slice %2 {offsets = [2, 0], sizes = [1, 512], strides = [1, 1]} : vector<9x512xf32> to vector<1x512xf32>
    %79 = vector.broadcast %78 : vector<1x512xf32> to vector<16x512xf32>
    %80 = arith.mulf %77, %79 : vector<16x512xf32>
    %81 = vector.extract_strided_slice %68 {offsets = [0, 16], sizes = [16, 512], strides = [1, 1]} : vector<16x546xf32> to vector<16x512xf32>
    %82 = vector.extract_strided_slice %2 {offsets = [3, 0], sizes = [1, 512], strides = [1, 1]} : vector<9x512xf32> to vector<1x512xf32>
    %83 = vector.broadcast %82 : vector<1x512xf32> to vector<16x512xf32>
    %84 = arith.mulf %81, %83 : vector<16x512xf32>
    %85 = vector.extract_strided_slice %68 {offsets = [0, 18], sizes = [16, 512], strides = [1, 1]} : vector<16x546xf32> to vector<16x512xf32>
    %86 = vector.extract_strided_slice %2 {offsets = [5, 0], sizes = [1, 512], strides = [1, 1]} : vector<9x512xf32> to vector<1x512xf32>
    %87 = vector.broadcast %86 : vector<1x512xf32> to vector<16x512xf32>
    %88 = arith.mulf %85, %87 : vector<16x512xf32>
    %89 = vector.extract_strided_slice %68 {offsets = [0, 32], sizes = [16, 512], strides = [1, 1]} : vector<16x546xf32> to vector<16x512xf32>
    %90 = vector.extract_strided_slice %2 {offsets = [6, 0], sizes = [1, 512], strides = [1, 1]} : vector<9x512xf32> to vector<1x512xf32>
    %91 = vector.broadcast %90 : vector<1x512xf32> to vector<16x512xf32>
    %92 = arith.mulf %89, %91 : vector<16x512xf32>
    %93 = vector.extract_strided_slice %68 {offsets = [0, 33], sizes = [16, 512], strides = [1, 1]} : vector<16x546xf32> to vector<16x512xf32>
    %94 = vector.extract_strided_slice %2 {offsets = [7, 0], sizes = [1, 512], strides = [1, 1]} : vector<9x512xf32> to vector<1x512xf32>
    %95 = vector.broadcast %94 : vector<1x512xf32> to vector<16x512xf32>
    %96 = arith.mulf %93, %95 : vector<16x512xf32>
    %97 = vector.extract_strided_slice %68 {offsets = [0, 34], sizes = [16, 512], strides = [1, 1]} : vector<16x546xf32> to vector<16x512xf32>
    %98 = vector.extract_strided_slice %2 {offsets = [8, 0], sizes = [1, 512], strides = [1, 1]} : vector<9x512xf32> to vector<1x512xf32>
    %99 = vector.broadcast %98 : vector<1x512xf32> to vector<16x512xf32>
    %100 = arith.mulf %97, %99 : vector<16x512xf32>
    %101 = tpu.concatenate %72, %76, %80, %84, %66, %88, %92, %96, %100 in 0 : vector<16x512xf32>, vector<16x512xf32>, vector<16x512xf32>, vector<16x512xf32>, vector<16x512xf32>, vector<16x512xf32>, vector<16x512xf32>, vector<16x512xf32>, vector<16x512xf32> -> vector<144x512xf32>
    %c0_29 = arith.constant 0 : index
    %c0_30 = arith.constant 0 : index
    %102 = vector.load %arg4[%c0_29, %c0_30] : memref<8x144xf32, #tpu.memory_space<vmem>>, vector<8x144xf32>
    %cst_31 = arith.constant dense<0.000000e+00> : vector<8x512xf32>
    %103 = tpu.matmul %102, %101, %cst_31 {dimension_numbers = #tpu.dot_dimension_numbers<[1], [0], [0], [1], [0, 0, 1, 1], [], []>} : vector<8x144xf32>, vector<144x512xf32>, vector<8x512xf32> -> vector<8x512xf32>
    %104 = arith.addf %1, %103 : vector<8x512xf32>
    %c0_32 = arith.constant 0 : index
    %c0_33 = arith.constant 0 : index
    %105 = vector.load %arg12[%c0_32, %c0_33] : memref<8x1xf32, #tpu.memory_space<vmem>>, vector<8x1xf32>
    %c0_34 = arith.constant 0 : index
    %c0_35 = arith.constant 0 : index
    %106 = vector.load %arg13[%c0_34, %c0_35] : memref<8x1xf32, #tpu.memory_space<vmem>>, vector<8x1xf32>
    %cst_36 = arith.constant dense<0.000000e+00> : vector<8x2xf32>
    %107 = tpu.matmul %104, %3, %cst_36 {dimension_numbers = #tpu.dot_dimension_numbers<[1], [0], [0], [1], [0, 0, 1, 1], [], []>} : vector<8x512xf32>, vector<512x2xf32>, vector<8x2xf32> -> vector<8x2xf32>
    %cst_37 = arith.constant 3.906250e-03 : f32
    %108 = vector.broadcast %cst_37 : f32 to vector<8x2xf32>
    %109 = arith.mulf %107, %108 : vector<8x2xf32>
    %cst_38 = arith.constant dense<0.000000e+00> : vector<8x512xf32>
    %110 = tpu.matmul %109, %4, %cst_38 {dimension_numbers = #tpu.dot_dimension_numbers<[1], [0], [0], [1], [0, 0, 1, 1], [], []>} : vector<8x2xf32>, vector<2x512xf32>, vector<8x512xf32> -> vector<8x512xf32>
    %111 = arith.subf %104, %110 : vector<8x512xf32>
    %112 = arith.mulf %111, %111 : vector<8x512xf32>
    %cst_39 = arith.constant dense<0.000000e+00> : vector<8x2xf32>
    %113 = tpu.matmul %112, %3, %cst_39 {dimension_numbers = #tpu.dot_dimension_numbers<[1], [0], [0], [1], [0, 0, 1, 1], [], []>} : vector<8x512xf32>, vector<512x2xf32>, vector<8x2xf32> -> vector<8x2xf32>
    %cst_40 = arith.constant 3.906250e-03 : f32
    %114 = vector.broadcast %cst_40 : f32 to vector<8x2xf32>
    %115 = arith.mulf %113, %114 : vector<8x2xf32>
    %cst_41 = arith.constant 9.99999974E-6 : f32
    %116 = vector.broadcast %cst_41 : f32 to vector<8x2xf32>
    %117 = arith.addf %115, %116 : vector<8x2xf32>
    %118 = math.rsqrt %117 : vector<8x2xf32>
    %119 = vector.broadcast %105 : vector<8x1xf32> to vector<8x2xf32>
    %120 = arith.mulf %118, %119 : vector<8x2xf32>
    %cst_42 = arith.constant dense<0.000000e+00> : vector<8x512xf32>
    %121 = tpu.matmul %120, %4, %cst_42 {dimension_numbers = #tpu.dot_dimension_numbers<[1], [0], [0], [1], [0, 0, 1, 1], [], []>} : vector<8x2xf32>, vector<2x512xf32>, vector<8x512xf32> -> vector<8x512xf32>
    %122 = arith.mulf %111, %121 : vector<8x512xf32>
    %123 = vector.broadcast %106 : vector<8x1xf32> to vector<8x512xf32>
    %124 = arith.addf %122, %123 : vector<8x512xf32>
    %125 = arith.addf %0, %124 : vector<8x512xf32>
    %cst_43 = arith.constant 0.000000e+00 : f32
    %126 = vector.broadcast %cst_43 : f32 to vector<8x512xf32>
    %127 = arith.maximumf %125, %126 : vector<8x512xf32>
    %c0_44 = arith.constant 0 : index
    %c0_45 = arith.constant 0 : index
    %128 = vector.load %arg14[%c0_44, %c0_45] : memref<8x1xf32, #tpu.memory_space<vmem>>, vector<8x1xf32>
    %c0_46 = arith.constant 0 : index
    %c0_47 = arith.constant 0 : index
    %129 = vector.load %arg15[%c0_46, %c0_47] : memref<8x1xf32, #tpu.memory_space<vmem>>, vector<8x1xf32>
    %cst_48 = arith.constant dense<0.000000e+00> : vector<8x2xf32>
    %130 = tpu.matmul %127, %3, %cst_48 {dimension_numbers = #tpu.dot_dimension_numbers<[1], [0], [0], [1], [0, 0, 1, 1], [], []>} : vector<8x512xf32>, vector<512x2xf32>, vector<8x2xf32> -> vector<8x2xf32>
    %cst_49 = arith.constant 3.906250e-03 : f32
    %131 = vector.broadcast %cst_49 : f32 to vector<8x2xf32>
    %132 = arith.mulf %130, %131 : vector<8x2xf32>
    %cst_50 = arith.constant dense<0.000000e+00> : vector<8x512xf32>
    %133 = tpu.matmul %132, %4, %cst_50 {dimension_numbers = #tpu.dot_dimension_numbers<[1], [0], [0], [1], [0, 0, 1, 1], [], []>} : vector<8x2xf32>, vector<2x512xf32>, vector<8x512xf32> -> vector<8x512xf32>
    %134 = arith.subf %127, %133 : vector<8x512xf32>
    %135 = arith.mulf %134, %134 : vector<8x512xf32>
    %cst_51 = arith.constant dense<0.000000e+00> : vector<8x2xf32>
    %136 = tpu.matmul %135, %3, %cst_51 {dimension_numbers = #tpu.dot_dimension_numbers<[1], [0], [0], [1], [0, 0, 1, 1], [], []>} : vector<8x512xf32>, vector<512x2xf32>, vector<8x2xf32> -> vector<8x2xf32>
    %cst_52 = arith.constant 3.906250e-03 : f32
    %137 = vector.broadcast %cst_52 : f32 to vector<8x2xf32>
    %138 = arith.mulf %136, %137 : vector<8x2xf32>
    %cst_53 = arith.constant 9.99999974E-6 : f32
    %139 = vector.broadcast %cst_53 : f32 to vector<8x2xf32>
    %140 = arith.addf %138, %139 : vector<8x2xf32>
    %141 = math.rsqrt %140 : vector<8x2xf32>
    %142 = vector.broadcast %128 : vector<8x1xf32> to vector<8x2xf32>
    %143 = arith.mulf %141, %142 : vector<8x2xf32>
    %cst_54 = arith.constant dense<0.000000e+00> : vector<8x512xf32>
    %144 = tpu.matmul %143, %4, %cst_54 {dimension_numbers = #tpu.dot_dimension_numbers<[1], [0], [0], [1], [0, 0, 1, 1], [], []>} : vector<8x2xf32>, vector<2x512xf32>, vector<8x512xf32> -> vector<8x512xf32>
    %145 = arith.mulf %134, %144 : vector<8x512xf32>
    %146 = vector.broadcast %129 : vector<8x1xf32> to vector<8x512xf32>
    %147 = arith.addf %145, %146 : vector<8x512xf32>
    %c0_55 = arith.constant 0 : index
    %c0_56 = arith.constant 0 : index
    %148 = vector.load %arg16[%c0_55, %c0_56] : memref<8x512xf32, #tpu.memory_space<vmem>>, vector<8x512xf32>
    tpu.vector_store %arg16[%c0_55, %c0_56], %147 {strides = array<i32>} : memref<8x512xf32, #tpu.memory_space<vmem>>, vector<8x512xf32>,
    return
  }
  func.func @transform_0(%arg0: i32) -> (i32, i32) {
    %c0_i32 = arith.constant 0 : i32
    %c0_i32_0 = arith.constant 0 : i32
    return %c0_i32, %arg0 : i32, i32
  }
  func.func @transform_1(%arg0: i32) -> (i32, i32) {
    %c0_i32 = arith.constant 0 : i32
    %c0_i32_0 = arith.constant 0 : i32
    return %c0_i32, %arg0 : i32, i32
  }
  func.func @transform_2(%arg0: i32) -> (i32, i32) {
    %c0_i32 = arith.constant 0 : i32
    %c0_i32_0 = arith.constant 0 : i32
    %c0_i32_1 = arith.constant 0 : i32
    return %c0_i32, %c0_i32_0 : i32, i32
  }
  func.func @transform_3(%arg0: i32) -> (i32, i32) {
    %c0_i32 = arith.constant 0 : i32
    %c0_i32_0 = arith.constant 0 : i32
    %c0_i32_1 = arith.constant 0 : i32
    return %c0_i32, %c0_i32_0 : i32, i32
  }
  func.func @transform_4(%arg0: i32) -> (i32, i32) {
    %c0_i32 = arith.constant 0 : i32
    %c0_i32_0 = arith.constant 0 : i32
    %c0_i32_1 = arith.constant 0 : i32
    return %c0_i32, %c0_i32_0 : i32, i32
  }
  func.func @transform_5(%arg0: i32) -> (i32, i32) {
    %c0_i32 = arith.constant 0 : i32
    %c0_i32_0 = arith.constant 0 : i32
    %c0_i32_1 = arith.constant 0 : i32
    return %c0_i32, %c0_i32_0 : i32, i32
  }
  func.func @transform_6(%arg0: i32) -> (i32, i32) {
    %c0_i32 = arith.constant 0 : i32
    %c0_i32_0 = arith.constant 0 : i32
    %c0_i32_1 = arith.constant 0 : i32
    return %c0_i32, %c0_i32_0 : i32, i32
  }
  func.func @transform_7(%arg0: i32) -> (i32, i32) {
    %c0_i32 = arith.constant 0 : i32
    %c0_i32_0 = arith.constant 0 : i32
    %c0_i32_1 = arith.constant 0 : i32
    return %c0_i32, %c0_i32_0 : i32, i32
  }
  func.func @transform_8(%arg0: i32) -> (i32, i32) {
    %c0_i32 = arith.constant 0 : i32
    %c0_i32_0 = arith.constant 0 : i32
    %c0_i32_1 = arith.constant 0 : i32
    return %c0_i32, %c0_i32_0 : i32, i32
  }
  func.func @transform_9(%arg0: i32) -> (i32, i32) {
    %c0_i32 = arith.constant 0 : i32
    %c0_i32_0 = arith.constant 0 : i32
    %c0_i32_1 = arith.constant 0 : i32
    return %c0_i32, %c0_i32_0 : i32, i32
  }
  func.func @transform_10(%arg0: i32) -> (i32, i32) {
    %c0_i32 = arith.constant 0 : i32
    %c0_i32_0 = arith.constant 0 : i32
    %c0_i32_1 = arith.constant 0 : i32
    return %c0_i32, %c0_i32_0 : i32, i32
  }
  func.func @transform_11(%arg0: i32) -> (i32, i32) {
    %c0_i32 = arith.constant 0 : i32
    %c0_i32_0 = arith.constant 0 : i32
    %c0_i32_1 = arith.constant 0 : i32
    return %c0_i32, %c0_i32_0 : i32, i32
  }
  func.func @transform_12(%arg0: i32) -> (i32, i32) {
    %c0_i32 = arith.constant 0 : i32
    %c0_i32_0 = arith.constant 0 : i32
    %c0_i32_1 = arith.constant 0 : i32
    return %c0_i32, %c0_i32_0 : i32, i32
  }
  func.func @transform_13(%arg0: i32) -> (i32, i32) {
    %c0_i32 = arith.constant 0 : i32
    %c0_i32_0 = arith.constant 0 : i32
    %c0_i32_1 = arith.constant 0 : i32
    return %c0_i32, %c0_i32_0 : i32, i32
  }
  func.func @transform_14(%arg0: i32) -> (i32, i32) {
    %c0_i32 = arith.constant 0 : i32
    %c0_i32_0 = arith.constant 0 : i32
    %c0_i32_1 = arith.constant 0 : i32
    return %c0_i32, %c0_i32_0 : i32, i32
  }
  func.func @transform_15(%arg0: i32) -> (i32, i32) {
    %c0_i32 = arith.constant 0 : i32
    %c0_i32_0 = arith.constant 0 : i32
    return %c0_i32, %arg0 : i32, i32
  }
}

</mosaic_0001>

<bundles_post_ra>
// kernel: resnet_layer_forward.1
= control target key start
LH: loop header
LB: loop body
LE: loop exit
PB: predicated region body
PF: predicated region fallthrough
CT: control target
= control target key end

     0   :  { %s5428_s17 = smov 0   ;;  %s6969_s0 = inlined_call_operand.vmem [shape: f32[8,1024], index: 0, kind: input, shape index: {}]   ;;  %s6970_s1 = inlined_call_operand.vmem [shape: f32[8,1024], index: 1, kind: input, shape index: {}]   ;;  %s6971_s2 = inlined_call_operand.vmem [shape: f32[16,72], index: 2, kind: input, shape index: {}]   ;;  %s6972_s3 = inlined_call_operand.vmem [shape: f32[8,144], index: 3, kind: input, shape index: {}]   ;;  %s6973_s4 = inlined_call_operand.vmem [shape: f32[16,16], index: 4, kind: input, shape index: {}]   ;;  %s6974_s5 = inlined_call_operand.vmem [shape: f32[8,8], index: 5, kind: input, shape index: {}]   ;;  %s6975_s6 = inlined_call_operand.vmem [shape: f32[9,512], index: 6, kind: input, shape index: {}]   ;;  %s6976_s7 = inlined_call_operand.vmem [shape: f32[512,2], index: 7, kind: input, shape index: {}]   ;;  %s6977_s8 = inlined_call_operand.vmem [shape: f32[2,512], index: 8, kind: input, shape index: {}]   ;;  %s6978_s9 = inlined_call_operand.vmem [shape: f32[16,1], index: 9, kind: input, shape index: {}]   ;;  %s6979_s10 = inlined_call_operand.vmem [shape: f32[16,1], index: 10, kind: input, shape index: {}]   ;;  %s6980_s11 = inlined_call_operand.vmem [shape: f32[8,1], index: 11, kind: input, shape index: {}]   ;;  %s6981_s12 = inlined_call_operand.vmem [shape: f32[8,1], index: 12, kind: input, shape index: {}]   ;;  %s6982_s13 = inlined_call_operand.vmem [shape: f32[8,1], index: 13, kind: input, shape index: {}]   ;;  %s6983_s14 = inlined_call_operand.vmem [shape: f32[8,1], index: 14, kind: input, shape index: {}]   ;;  %s6984_s15 = inlined_call_operand.vmem [shape: f32[8,1024], index: 15, kind: output, shape index: {}]  }
   0x1 LB: > { %s4029_s18 = sadd.s32 4294967295, %s5328_s17   ;;  %p4033_p0 = scmp.ge.s32.totalorder %s5328_s17, 1  ;;  %s5328_s17 = sphi %s5428_s17, %s25_s17  }
   0x2   : > { %p449_p1 = scmp.lt.s32.totalorder %s5328_s17, 3 }
   0x4   : > { %p450_p2 = pnand %p4033_p0, %p449_p1 }
   0x6   : > { %453 = sbr.rel (%p450_p2) target bundleno = 4187 (0x105b), region = 80 }
   0xd   : > { %s4034_s19 = sshll.u32 %s4029_s18, 2  ;;  %v624_v0 = vlaneseq  ;;  %s5330_s24 = smov 17   ;;  %v5459_v4 = vld [vmem:[%s6975_s6 + $0x8] sm:$0xff]  ;;  %v5471_v8 = vld [vmem:[%s6975_s6] sm:$0xff]  ;;  %v5482_v11 = vld [vmem:[%s6975_s6 + $0x18] sm:$0xff]  ;;  %vm672_vm0 = vcmask 7168  }
   0xe   : > { %p503_p3 = scmp.lt.s32.totalorder %s4034_s19, 7  ;;  %v5487_v12 = vld [vmem:[%s6975_s6 + $0x10] sm:$0xff]  ;;  %s5331_s18 = smov 1   ;;  %v4041_v40 = vld [vmem:[%s6975_s6 + $0x28] ss:$0 sm:$0xff]  ;;  %vm613_vm1 = vcmask 138240  }
   0xf   : > { %v5436_v1 = vshrl.u32 %v624_v0, 7  ;;  %s5333_s21 = smov 16   ;;  %s5334_s22 = smov 18   ;;  %v4040_v41 = vld [vmem:[%s6975_s6 + $0x20] ss:$0 sm:$0xff]  ;;  %vm714_vm2 = vcmask 15360  }
  0x10   : > { %s7284_s19 = smov (!%p503_p3, %s4034_s19), 7  ;;  %s5335_s25 = smov 32   ;;  %v4043_v42 = vld [vmem:[%s6975_s6 + $0x38] ss:$0 sm:$0xff]  ;;  %v4042_v43 = vld [vmem:[%s6975_s6 + $0x30] ss:$0 sm:$0xff] }
  0x11   : > { %s5438_s20 = sshll.u32 %s7284_s19, 3  ;;  %v646_v5 = vsub.s32 1, %v5436_v1  ;;  %v688_v15 = vsub.s32 2, %v5436_v1  ;;  %s5332_s19 = smov 2   ;;  %v730_v20 = vsub.s32 3, %v5436_v1  ;;  %v772_v25 = vsub.s32 5, %v5436_v1 }
  0x12   : > { %s5444_s23 = scalar_lea.vmem %s6969_s0, %s5438_s20  ;;  %v814_v30 = vsub.s32 6, %v5436_v1  ;;  %v856_v35 = vsub.s32 7, %v5436_v1  ;;  %s5336_s5 = smov 33   ;;  %vm756_vm3 = vcmask 130048   ;;  %vm798_vm4 = vcmask 146432  }
  0x13   : > { %v5447_v2 = vld [vmem:[%s5444_s23 + $0x10] sm:$0xff]  ;;  %v5450_v3 = vld [vmem:[%s5444_s23] sm:$0xff]  ;;  %v5463_v6 = vld [vmem:[%s5444_s23 + $0x18] sm:$0xff]  ;;  %v651_v9 = vrot.slane %v5459_v4, %v646_v5  ;;  %v647_v10 = vrot.slane %v5471_v8, %v646_v5  ;;  %v659_v13 = vrot.slane %v5482_v11, %v646_v5  ;;  %v655_v14 = vrot.slane %v5487_v12, %v646_v5  ;;  %s5337_s30 = smov 34   ;;  %s6999_s26 = smov 110  }
  0x14   : > { %609 = vrot.lane.b32.xlu1 %v5447_v2, %s5330_s24  ;;  %605 = vrot.lane.b32.xlu0 %v5450_v3, %s5330_s24  ;;  %v5466_v7 = vld [vmem:[%s5444_s23 + $0x8] sm:$0xff]  ;;  %v693_v16 = vrot.slane %v5459_v4, %v688_v15  ;;  %v689_v17 = vrot.slane %v5471_v8, %v688_v15  ;;  %v701_v18 = vrot.slane %v5482_v11, %v688_v15  ;;  %vm840_vm5 = vcmask 261120   ;;  %s6997_s27 = smov 96   ;;  %s6995_s28 = smov 95  }
  0x15   : > { %v697_v19 = vrot.slane %v5487_v12, %v688_v15  ;;  %v735_v21 = vrot.slane %v5459_v4, %v730_v20  ;;  %v731_v22 = vrot.slane %v5471_v8, %v730_v20  ;;  %v743_v23 = vrot.slane %v5482_v11, %v730_v20  ;;  %s6993_s29 = smov 94   ;;  %s7247_s16 = smov 94  }
  0x16   : > { %v739_v24 = vrot.slane %v5487_v12, %v730_v20  ;;  %v777_v26 = vrot.slane %v5459_v4, %v772_v25  ;;  %v773_v27 = vrot.slane %v5471_v8, %v772_v25  ;;  %v785_v28 = vrot.slane %v5482_v11, %v772_v25 }
  0x17   : > { %v781_v29 = vrot.slane %v5487_v12, %v772_v25  ;;  %v819_v31 = vrot.slane %v5459_v4, %v814_v30  ;;  %v815_v32 = vrot.slane %v5471_v8, %v814_v30  ;;  %v827_v33 = vrot.slane %v5482_v11, %v814_v30 }
  0x18   : > { %611 = vrot.lane.b32.xlu1 %v5463_v6, %s5330_s24  ;;  %607 = vrot.lane.b32.xlu0 %v5466_v7, %s5330_s24  ;;  %v823_v34 = vrot.slane %v5487_v12, %v814_v30  ;;  %v861_v36 = vrot.slane %v5459_v4, %v856_v35  ;;  %v857_v37 = vrot.slane %v5471_v8, %v856_v35  ;;  %vm882_vm6 = vcmask 269312  }
  0x19   : > { %v869_v38 = vrot.slane %v5482_v11, %v856_v35  ;;  %v865_v39 = vrot.slane %v5487_v12, %v856_v35  ;;  %vm924_vm7 = vcmask 277504   ;;  %vm953_vm8 = vcmask 1039360  }
  0x1a   : > { %vm977_vm9 = vcmask 1031168   ;;  %vm1001_vm10 = vcmask 916480   ;;  %vm1025_vm11 = vcmask 900096   ;;  %vm1049_vm12 = vcmask 785408  }
  0x1b   : > { %vm1073_vm13 = vcmask 777216   ;;  %vm1097_vm14 = vcmask 769024   ;;  %vm1108_vm15 = vcmask 588800  }
  0x1c   : > { %666 = vrot.lane.b32.xlu1 %v651_v9, %s5331_s18  ;;  %664 = vrot.lane.b32.xlu0 %v647_v10, %s5331_s18 }
  0x20   : > { %670 = vrot.lane.b32.xlu1 %v659_v13, %s5331_s18  ;;  %668 = vrot.lane.b32.xlu0 %v655_v14, %s5331_s18 }
  0x24   : > { %708 = vrot.lane.b32.xlu1 %v693_v16, %s5332_s19  ;;  %706 = vrot.lane.b32.xlu0 %v689_v17, %s5332_s19 }
  0x28   : > { %712 = vrot.lane.b32.xlu1 %v701_v18, %s5332_s19  ;;  %710 = vrot.lane.b32.xlu0 %v697_v19, %s5332_s19 }
  0x2c   : > { %750 = vrot.lane.b32.xlu1 %v735_v21, %s5333_s21  ;;  %748 = vrot.lane.b32.xlu0 %v731_v22, %s5333_s21 }
  0x30   : > { %754 = vrot.lane.b32.xlu1 %v743_v23, %s5333_s21  ;;  %752 = vrot.lane.b32.xlu0 %v739_v24, %s5333_s21  ;;  %s7234_s21 = smov 96  }
  0x34   : > { %792 = vrot.lane.b32.xlu1 %v777_v26, %s5334_s22  ;;  %790 = vrot.lane.b32.xlu0 %v773_v27, %s5334_s22 }
  0x38   : > { %796 = vrot.lane.b32.xlu1 %v785_v28, %s5334_s22  ;;  %794 = vrot.lane.b32.xlu0 %v781_v29, %s5334_s22  ;;  %s7005_s22 = smov 127  }
  0x3c   : > { %834 = vrot.lane.b32.xlu1 %v819_v31, %s5335_s25  ;;  %832 = vrot.lane.b32.xlu0 %v815_v32, %s5335_s25 }
  0x40   : > { %838 = vrot.lane.b32.xlu1 %v827_v33, %s5335_s25  ;;  %836 = vrot.lane.b32.xlu0 %v823_v34, %s5335_s25  ;;  %s7003_s25 = smov 126  }
  0x44   : > { %876 = vrot.lane.b32.xlu1 %v861_v36, %s5336_s5  ;;  %874 = vrot.lane.b32.xlu0 %v857_v37, %s5336_s5 }
  0x48   : > { %880 = vrot.lane.b32.xlu1 %v869_v38, %s5336_s5  ;;  %878 = vrot.lane.b32.xlu0 %v865_v39, %s5336_s5  ;;  %s7001_s5 = smov 112  }
  0x4c   : > { %918 = vrot.lane.b32.xlu1 %v4041_v40, %s5337_s30  ;;  %916 = vrot.lane.b32.xlu0 %v4040_v41, %s5337_s30 }
  0x50   : > { %922 = vrot.lane.b32.xlu1 %v4043_v42, %s5337_s30  ;;  %920 = vrot.lane.b32.xlu0 %v4042_v43, %s5337_s30  ;;  %s7238_s30 = smov 95  }
  0x86   : > { %v610_v44 = vpop.permute.xlu1 %609  ;;  %v606_v45 = vpop.permute.xlu0 %605 }
  0x87   : > { %v5565_v10 = vsel %vm613_vm1, 0.0, %v606_v45 }
  0x8a   : > { %v612_v46 = vpop.permute.xlu1 %611  ;;  %v608_v47 = vpop.permute.xlu0 %607 }
  0x8b   : > { %v5534_v51 = vsel %vm613_vm1, %v610_v44, %v612_v46  ;;  %v5537_v52 = vsel %vm613_vm1, %v612_v46, 0.0  ;;  %v5540_v53 = vsel %vm613_vm1, %v606_v45, %v608_v47  ;;  %v5545_v56 = vsel %vm613_vm1, %v608_v47, %v610_v44 }
  0x8e   : > { %v667_v48 = vpop.permute.xlu1 %666  ;;  %v5528_v49 = vpop.permute.xlu0 %664 }
  0x8f   : > { %7136 = vst [vmem:[#allocation2_spill] sm:$0xff] %v5528_v49  ;;  %v5531_v50 = vsel %vm672_vm0, %v5528_v49, %v667_v48  ;;  %v681_v16 = vmul.f32 %v5528_v49, %v5565_v10 }
  0x90   : > { %v682_v62 = vmul.f32 %v5531_v50, %v5540_v53 }
  0x92   : > { %v5542_v54 = vpop.permute.xlu1 %670  ;;  %v669_v55 = vpop.permute.xlu0 %668 }
  0x93   : > { %v5547_v57 = vsel %vm672_vm0, %v667_v48, %v669_v55  ;;  %v5550_v58 = vsel %vm672_vm0, %v669_v55, %v5542_v54  ;;  %v685_v59 = vmul.f32 %v5542_v54, %v5537_v52  ;;  %vm1540_vm0 = vcmask 1041408  }
  0x94   : > { %v683_v60 = vmul.f32 %v5547_v57, %v5545_v56  ;;  %v684_v61 = vmul.f32 %v5550_v58, %v5534_v51 }
  0x96   : > { %v709_v63 = vpop.permute.xlu1 %708  ;;  %v5560_v0 = vpop.permute.xlu0 %706  ;;  %v5077_v5 = vpack.i.bf16 %v685_v59, %v684_v61  ;;  %v5072_v9 = vpack.i.bf16 %v683_v60, %v682_v62 }
  0x97   : > { %7137 = vst [vmem:[#allocation3_spill] sm:$0xff] %v5560_v0  ;;  %v5569_v13 = vsel %vm714_vm2, %v5560_v0, %v709_v63  ;;  %v723_v44 = vmul.f32 %v5560_v0, %v5565_v10  ;;  %v547_v0 = vld [vmem:[%s6976_s7 + $0x58] sm:$0xff] }
  0x98   : > { %5078 = vrot.lane.b32.xlu1 %v5077_v5, %s7005_s22  ;;  %5073 = vrot.lane.b32.xlu0 %v5072_v9, %s7005_s22  ;;  %7138 = vst [vmem:[#allocation4_spill] sm:$0xff] %v5569_v13  ;;  %v724_v22 = vmul.f32 %v5569_v13, %v5540_v53 }
  0x9a   : > { %v5571_v14 = vpop.permute.xlu1 %712  ;;  %v711_v15 = vpop.permute.xlu0 %710 }
  0x9b   : > { %7139 = vst [vmem:[#allocation5_spill] sm:$0xff] %v5571_v14  ;;  %v727_v17 = vmul.f32 %v5571_v14, %v5537_v52  ;;  %v5578_v18 = vsel %vm714_vm2, %v709_v63, %v711_v15  ;;  %v5582_v19 = vsel %vm714_vm2, %v711_v15, %v5571_v14  ;;  %v6132_v14 = vld [vmem:[%s6973_s4 + $0x8] sm:$0xff] }
  0x9c   : > { %7140 = vst [vmem:[#allocation6_spill] sm:$0xff] %v5578_v18  ;;  %v725_v20 = vmul.f32 %v5578_v18, %v5545_v56  ;;  %v726_v21 = vmul.f32 %v5582_v19, %v5534_v51  ;;  %943 = vrot.lane.b32.xlu0 %v681_v16, %s7005_s22  ;;  %s7229_s22 = smov 110  }
  0x9e   : > { %v751_v23 = vpop.permute.xlu1 %750  ;;  %v5591_v24 = vpop.permute.xlu0 %748  ;;  %v5087_v25 = vpack.i.bf16 %v727_v17, %v726_v21  ;;  %v5082_v26 = vpack.i.bf16 %v725_v20, %v724_v22 }
  0x9f   : > { %7141 = vst [vmem:[#allocation7_spill] sm:$0xff] %v5591_v24  ;;  %v5597_v27 = vsel %vm756_vm3, %v5591_v24, %v751_v23  ;;  %v765_v43 = vmul.f32 %v5591_v24, %v5565_v10 }
  0xa0   : > { %5088 = vrot.lane.b32.xlu0 %v5087_v25, %s7003_s25  ;;  %5083 = vrot.lane.b32.xlu1 %v5082_v26, %s7003_s25  ;;  %7142 = vst [vmem:[#allocation8_spill] sm:$0xff] %v5597_v27  ;;  %v766_v35 = vmul.f32 %v5597_v27, %v5540_v53 }
  0xa2   : > { %v5599_v28 = vpop.permute.xlu1 %754  ;;  %v753_v29 = vpop.permute.xlu0 %752 }
  0xa3   : > { %7143 = vst [vmem:[#allocation9_spill] sm:$0xff] %v5599_v28  ;;  %v769_v30 = vmul.f32 %v5599_v28, %v5537_v52  ;;  %v5604_v31 = vsel %vm756_vm3, %v751_v23, %v753_v29  ;;  %v5608_v32 = vsel %vm756_vm3, %v753_v29, %v5599_v28 }
  0xa4   : > { %7144 = vst [vmem:[#allocation10_spill] sm:$0xff] %v5604_v31  ;;  %7145 = vst [vmem:[#allocation11_spill] sm:$0xff] %v5608_v32  ;;  %v767_v33 = vmul.f32 %v5604_v31, %v5545_v56  ;;  %v768_v34 = vmul.f32 %v5608_v32, %v5534_v51 }
  0xa6   : > { %v793_v36 = vpop.permute.xlu1 %792  ;;  %v5616_v37 = vpop.permute.xlu0 %790  ;;  %v5097_v38 = vpack.i.bf16 %v769_v30, %v768_v34  ;;  %v5092_v39 = vpack.i.bf16 %v767_v33, %v766_v35 }
  0xa7   : > { %7146 = vst [vmem:[#allocation12_spill] sm:$0xff] %v5616_v37  ;;  %v5621_v40 = vsel %vm798_vm4, %v5616_v37, %v793_v36  ;;  %v807_v16 = vmul.f32 %v5616_v37, %v5565_v10  ;;  %v546_v37 = vld [vmem:[%s6976_s7 + $0x50] sm:$0xff] }
  0xa8   : > { %5098 = vrot.lane.b32.xlu0 %v5097_v38, %s7001_s5  ;;  %5093 = vrot.lane.b32.xlu1 %v5092_v39, %s7001_s5  ;;  %7147 = vst [vmem:[#allocation13_spill] sm:$0xff] %v5621_v40  ;;  %v808_v59 = vmul.f32 %v5621_v40, %v5540_v53 }
  0xaa   : > { %v5623_v41 = vpop.permute.xlu1 %796  ;;  %v795_v42 = vpop.permute.xlu0 %794 }
  0xab   : > { %7148 = vst [vmem:[#allocation14_spill] sm:$0xff] %v5623_v41  ;;  %v811_v45 = vmul.f32 %v5623_v41, %v5537_v52  ;;  %v5631_v46 = vsel %vm798_vm4, %v793_v36, %v795_v42  ;;  %v5634_v47 = vsel %vm798_vm4, %v795_v42, %v5623_v41 }
  0xac   : > { %7149 = vst [vmem:[#allocation15_spill] sm:$0xff] %v5631_v46  ;;  %7150 = vst [vmem:[#allocation16_spill] sm:$0xff] %v5634_v47  ;;  %v809_v48 = vmul.f32 %v5631_v46, %v5545_v56  ;;  %v810_v55 = vmul.f32 %v5634_v47, %v5534_v51  ;;  %991 = vrot.lane.b32.xlu0 %v765_v43, %s7001_s5  ;;  %967 = vrot.lane.b32.xlu1 %v723_v44, %s7003_s25  ;;  %s518_s5 = scalar_lea.vmem %s6984_s15, %s5438_s20 }
  0xae   : > { %v835_v60 = vpop.permute.xlu1 %834  ;;  %v5644_v61 = vpop.permute.xlu0 %832  ;;  %v5107_v62 = vpack.i.bf16 %v811_v45, %v810_v55  ;;  %v5102_v63 = vpack.i.bf16 %v809_v48, %v808_v59 }
  0xaf   : > { %7151 = vst [vmem:[#allocation17_spill] sm:$0xff] %v5644_v61  ;;  %v5649_v5 = vsel %vm840_vm5, %v5644_v61, %v835_v60 }
  0xb0   : > { %5108 = vrot.lane.b32.xlu0 %v5107_v62, %s6999_s26  ;;  %5103 = vrot.lane.b32.xlu1 %v5102_v63, %s6999_s26  ;;  %7152 = vst [vmem:[#allocation18_spill] sm:$0xff] %v5649_v5  ;;  %v850_v25 = vmul.f32 %v5649_v5, %v5540_v53  ;;  %v6985_v62 = vmov 0.0  }
  0xb1   : > { %1256 = vmatprep.mubr.f32.mxu1 %v6985_v62  ;;  %1179 = vmatprep.mubr.f32.mxu0 %v6985_v62 }
  0xb2   : > { %v5651_v9 = vpop.permute.xlu1 %838  ;;  %v837_v15 = vpop.permute.xlu0 %836 }
  0xb3   : > { %7153 = vst [vmem:[#allocation19_spill] sm:$0xff] %v5651_v9  ;;  %v853_v17 = vmul.f32 %v5651_v9, %v5537_v52  ;;  %v5657_v20 = vsel %vm840_vm5, %v835_v60, %v837_v15  ;;  %v5660_v21 = vsel %vm840_vm5, %v837_v15, %v5651_v9 }
  0xb4   : > { %7154 = vst [vmem:[#allocation20_spill] sm:$0xff] %v5657_v20  ;;  %7155 = vst [vmem:[#allocation21_spill] sm:$0xff] %v5660_v21  ;;  %v851_v22 = vmul.f32 %v5657_v20, %v5545_v56  ;;  %v852_v23 = vmul.f32 %v5660_v21, %v5534_v51  ;;  %1015 = vrot.lane.b32.xlu1 %v807_v16, %s6999_s26  ;;  %v849_v16 = vmul.f32 %v5644_v61, %v5565_v10 }
  0xb6   : > { %v877_v26 = vpop.permute.xlu1 %876  ;;  %v5669_v29 = vpop.permute.xlu0 %874  ;;  %v5117_v30 = vpack.i.bf16 %v853_v17, %v852_v23  ;;  %v5112_v33 = vpack.i.bf16 %v851_v22, %v850_v25 }
  0xb7   : > { %7156 = vst [vmem:[#allocation22_spill] sm:$0xff] %v5669_v29  ;;  %v5674_v34 = vsel %vm882_vm6, %v5669_v29, %v877_v26  ;;  %v891_v15 = vmul.f32 %v5669_v29, %v5565_v10 }
  0xb8   : > { %5118 = vrot.lane.b32.xlu1 %v5117_v30, %s6997_s27  ;;  %5113 = vrot.lane.b32.xlu0 %v5112_v33, %s6997_s27  ;;  %7157 = vst [vmem:[#allocation23_spill] sm:$0xff] %v5674_v34  ;;  %v892_v45 = vmul.f32 %v5674_v34, %v5540_v53 }
  0xba   : > { %v5676_v35 = vpop.permute.xlu1 %880  ;;  %v879_v36 = vpop.permute.xlu0 %878 }
  0xbb   : > { %7158 = vst [vmem:[#allocation24_spill] sm:$0xff] %v5676_v35  ;;  %v895_v38 = vmul.f32 %v5676_v35, %v5537_v52  ;;  %v5680_v39 = vsel %vm882_vm6, %v877_v26, %v879_v36  ;;  %v5683_v42 = vsel %vm882_vm6, %v879_v36, %v5676_v35 }
  0xbc   : > { %7159 = vst [vmem:[#allocation25_spill] sm:$0xff] %v5680_v39  ;;  %7160 = vst [vmem:[#allocation26_spill] sm:$0xff] %v5683_v42  ;;  %v893_v43 = vmul.f32 %v5680_v39, %v5545_v56  ;;  %v894_v44 = vmul.f32 %v5683_v42, %v5534_v51 }
  0xbe   : > { %v919_v48 = vpop.permute.xlu1 %918  ;;  %v5691_v55 = vpop.permute.xlu0 %916  ;;  %v5127_v59 = vpack.i.bf16 %v895_v38, %v894_v44  ;;  %v5122_v60 = vpack.i.bf16 %v893_v43, %v892_v45  ;;  %v626_v43 = vsub.s32 0, %v5436_v1 }
  0xbf   : > { %7161 = vst [vmem:[#allocation27_spill] sm:$0xff] %v5691_v55  ;;  %v5704_v22 = vsel %vm924_vm7, %v5691_v55, %v919_v48  ;;  %v933_v38 = vmul.f32 %v5691_v55, %v5565_v10 }
  0xc0   : > { %5128 = vrot.lane.b32.xlu1 %v5127_v59, %s6995_s28  ;;  %5123 = vrot.lane.b32.xlu0 %v5122_v60, %s6995_s28  ;;  %7163 = vst [vmem:[#allocation29_spill] sm:$0xff] %v5704_v22  ;;  %v934_v25 = vmul.f32 %v5704_v22, %v5540_v53  ;;  %v5730_v44 = vrot.slane %v5459_v4, %v626_v43 }
  0xc1   : > { %v5733_v45 = vrot.slane %v5482_v11, %v626_v43  ;;  %v5739_v60 = vrot.slane %v5471_v8, %v626_v43 }
  0xc2   : > { %v921_v63 = vpop.permute.xlu0 %920  ;;  %v5706_v23 = vpop.permute.xlu1 %922  ;;  %7166 = vst [vmem:[#allocation32_spill] sm:$0xff] %v5730_v44  ;;  %v641_v4 = vmul.f32 %v5730_v44, %v5540_v53 }
  0xc3   : > { %v5701_v17 = vsel %vm924_vm7, %v919_v48, %v921_v63  ;;  %7164 = vst [vmem:[#allocation30_spill] sm:$0xff] %v5706_v23  ;;  %v5715_v30 = vsel %vm924_vm7, %v921_v63, %v5706_v23  ;;  %v937_v36 = vmul.f32 %v5706_v23, %v5537_v52  ;;  %7167 = vst [vmem:[#allocation33_spill] sm:$0xff] %v5733_v45 }
  0xc4   : > { %7162 = vst [vmem:[#allocation28_spill] sm:$0xff] %v5701_v17  ;;  %1063 = vrot.lane.b32.xlu1 %v891_v15, %s6995_s28  ;;  %1039 = vrot.lane.b32.xlu0 %v849_v16, %s6997_s27  ;;  %v935_v26 = vmul.f32 %v5701_v17, %v5545_v56  ;;  %7165 = vst [vmem:[#allocation31_spill] sm:$0xff] %v5715_v30  ;;  %v936_v33 = vmul.f32 %v5715_v30, %v5534_v51  ;;  %v544_v30 = vld [vmem:[%s6976_s7 + $0x40] sm:$0xff]  ;;  %v545_v17 = vld [vmem:[%s6976_s7 + $0x48] sm:$0xff]  ;;  %s7217_s27 = smov 126   ;;  %s7224_s28 = smov 112  }
  0xc5   : > { %v5736_v48 = vrot.slane %v5487_v12, %v626_v43  ;;  %7169 = vst [vmem:[#allocation35_spill] sm:$0xff] %v5739_v60  ;;  %v643_v11 = vmul.f32 %v5733_v45, %v5534_v51 }
  0xc7   : > { %7168 = vst [vmem:[#allocation34_spill] sm:$0xff] %v5736_v48  ;;  %v642_v12 = vmul.f32 %v5736_v48, %v5545_v56 }
  0xc8   : > { %1089 = vrot.lane.b32.xlu0 %v934_v25, %s6993_s29  ;;  %1091 = vrot.lane.b32.xlu1 %v935_v26, %s6993_s29 }
  0xcc   : > { %1093 = vrot.lane.b32.xlu0 %v936_v33, %s6993_s29  ;;  %1095 = vrot.lane.b32.xlu1 %v937_v36, %s6993_s29 }
  0xd0   : > { %1087 = vrot.lane.b32.xlu0 %v933_v38, %s6993_s29  ;;  %s512_s29 = scalar_lea.vmem %s6970_s1, %s5438_s20 }
 0x10a   : > { %v5079_v52 = vpop.permute.xlu1 %5078  ;;  %v5074_v59 = vpop.permute.xlu0 %5073 }
 0x10b   : > { %v5081_v63 = vunpack.i.h.bf16 %v5079_v52  ;;  %v5080_v15 = vunpack.i.l.bf16 %v5079_v52  ;;  %v5076_v16 = vunpack.i.h.bf16 %v5074_v59  ;;  %v5075_v25 = vunpack.i.l.bf16 %v5074_v59 }
 0x10c   : > { %v640_v59 = vmul.f32 %v5739_v60, %v5565_v10 }
 0x10d   : > { %v955_v26 = vsel %vm953_vm8, %v5075_v25, %v5076_v16  ;;  %v957_v33 = vsel %vm953_vm8, %v5080_v15, %v5081_v63  ;;  %v956_v8 = vsel %vm953_vm8, %v5076_v16, %v5080_v15 }
 0x10e   : > { %v944_v36 = vpop.permute.xlu0 %943  ;;  %v4550_v38 = vpack.c.bf16 %v955_v26, %v641_v4  ;;  %v4566_v43 = vpack.c.bf16 %v957_v33, %v643_v11  ;;  %v4568_v52 = vpack.c.bf16 %v956_v8, %v642_v12 }
 0x10f   : > { %v954_v53 = vsel %vm953_vm8, %v944_v36, %v5075_v25 }
 0x110   : > { %4551 = vmatprep.subr.bf16.mxu0 %v4550_v38  ;;  %4567 = vmatprep.subr.bf16.mxu1 %v4566_v43  ;;  %v4552_v51 = vpack.c.bf16 %v954_v53, %v640_v59 }
 0x111   : > { %4569 = vmatpush1.bf16.msra.mxu1 %v4568_v52 }
 0x112   : > { %4553 = vmatpush1.bf16.msra.mxu0 %v4552_v51  ;;  %v5084_v56 = vpop.permute.xlu1 %5083  ;;  %v5089_v62 = vpop.permute.xlu0 %5088 }
 0x113   : > { %v5086_v55 = vunpack.i.h.bf16 %v5084_v56  ;;  %v5085_v63 = vunpack.i.l.bf16 %v5084_v56  ;;  %v5091_v22 = vunpack.i.h.bf16 %v5089_v62  ;;  %v5090_v15 = vunpack.i.l.bf16 %v5089_v62 }
 0x115   : > { %v979_v25 = vsel %vm977_vm9, %v5085_v63, %v5086_v55  ;;  %v981_v33 = vsel %vm977_vm9, %v5090_v15, %v5091_v22  ;;  %v980_v38 = vsel %vm977_vm9, %v5086_v55, %v5090_v15 }
 0x11a   : > { %v5094_v16 = vpop.permute.xlu1 %5093  ;;  %v5099_v4 = vpop.permute.xlu0 %5098 }
 0x11b   : > { %v5096_v11 = vunpack.i.h.bf16 %v5094_v16  ;;  %v5095_v12 = vunpack.i.l.bf16 %v5094_v16  ;;  %v5101_v10 = vunpack.i.h.bf16 %v5099_v4  ;;  %v5100_v26 = vunpack.i.l.bf16 %v5099_v4 }
 0x11d   : > { %v1003_v8 = vsel %vm1001_vm10, %v5095_v12, %v5096_v11  ;;  %v1005_v36 = vsel %vm1001_vm10, %v5100_v26, %v5101_v10  ;;  %v1004_v62 = vsel %vm1001_vm10, %v5096_v11, %v5100_v26 }
 0x11e   : > { %v968_v43 = vpop.permute.xlu1 %967  ;;  %v992_v52 = vpop.permute.xlu0 %991  ;;  %v4554_v59 = vpack.c.bf16 %v1003_v8, %v979_v25  ;;  %v4570_v53 = vpack.c.bf16 %v1005_v36, %v981_v33  ;;  %v4572_v51 = vpack.c.bf16 %v1004_v62, %v980_v38 }
 0x11f   : > { %v978_v56 = vsel %vm977_vm9, %v968_v43, %v5085_v63  ;;  %v1002_v16 = vsel %vm1001_vm10, %v992_v52, %v5095_v12 }
 0x120   : > { %v4556_v4 = vpack.c.bf16 %v1002_v16, %v978_v56  ;;  %4555 = vmatprep.subr.bf16.mxu0 %v4554_v59  ;;  %4571 = vmatprep.subr.bf16.mxu1 %v4570_v53 }
 0x121   : > { %4573 = vmatpush1.bf16.msra.mxu1 %v4572_v51 }
 0x122   : > { %v5104_v22 = vpop.permute.xlu1 %5103  ;;  %v5109_v23 = vpop.permute.xlu0 %5108  ;;  %4557 = vmatpush1.bf16.msra.mxu0 %v4556_v4 }
 0x123   : > { %v5106_v55 = vunpack.i.h.bf16 %v5104_v22  ;;  %v5105_v15 = vunpack.i.l.bf16 %v5104_v22  ;;  %v5111_v11 = vunpack.i.h.bf16 %v5109_v23  ;;  %v5110_v10 = vunpack.i.l.bf16 %v5109_v23 }
 0x125   : > { %v1027_v26 = vsel %vm1025_vm11, %v5105_v15, %v5106_v55  ;;  %v1029_v25 = vsel %vm1025_vm11, %v5110_v10, %v5111_v11  ;;  %v1028_v63 = vsel %vm1025_vm11, %v5106_v55, %v5110_v10 }
 0x126   : > { %v1016_v33 = vpop.permute.xlu1 %1015  ;;  %v4558_v12 = vpack.c.bf16 %v1027_v26, %v5466_v7  ;;  %v4574_v8 = vpack.c.bf16 %v1029_v25, %v5463_v6  ;;  %v4576_v36 = vpack.c.bf16 %v1028_v63, %v5447_v2 }
 0x127   : > { %v1026_v38 = vsel %vm1025_vm11, %v1016_v33, %v5105_v15 }
 0x128   : > { %v4560_v62 = vpack.c.bf16 %v1026_v38, %v5450_v3  ;;  %4559 = vmatprep.subr.bf16.mxu0 %v4558_v12  ;;  %4575 = vmatprep.subr.bf16.mxu1 %v4574_v8 }
 0x129   : > { %4577 = vmatpush1.bf16.msra.mxu1 %v4576_v36 }
 0x12a   : > { %4561 = vmatpush1.bf16.msra.mxu0 %v4560_v62  ;;  %v5119_v23 = vpop.permute.xlu1 %5118  ;;  %v5114_v43 = vpop.permute.xlu0 %5113 }
 0x12b   : > { %v5121_v52 = vunpack.i.h.bf16 %v5119_v23  ;;  %v5120_v59 = vunpack.i.l.bf16 %v5119_v23  ;;  %v5116_v53 = vunpack.i.h.bf16 %v5114_v43  ;;  %v5115_v51 = vunpack.i.l.bf16 %v5114_v43 }
 0x12d   : > { %v1051_v3 = vsel %vm1049_vm12, %v5115_v51, %v5116_v53  ;;  %v1053_v22 = vsel %vm1049_vm12, %v5120_v59, %v5121_v52  ;;  %v1052_v11 = vsel %vm1049_vm12, %v5116_v53, %v5120_v59  ;;  %v584_v52 = vld [vmem:[%s6976_s7 + $0x180] sm:$0xff]  ;;  %v585_v59 = vld [vmem:[%s6976_s7 + $0x188] sm:$0xff] }
 0x12e   : > { %v568_v53 = vld [vmem:[%s6976_s7 + $0x100] sm:$0xff] }
 0x132   : > { %v5129_v7 = vpop.permute.xlu1 %5128  ;;  %v5124_v56 = vpop.permute.xlu0 %5123 }
 0x133   : > { %v5131_v6 = vunpack.i.h.bf16 %v5129_v7  ;;  %v5130_v2 = vunpack.i.l.bf16 %v5129_v7  ;;  %v5126_v16 = vunpack.i.h.bf16 %v5124_v56  ;;  %v5125_v4 = vunpack.i.l.bf16 %v5124_v56  ;;  %v586_v7 = vld [vmem:[%s6976_s7 + $0x190] sm:$0xff]  ;;  %v587_v56 = vld [vmem:[%s6976_s7 + $0x198] sm:$0xff] }
 0x135   : > { %v1075_v55 = vsel %vm1073_vm13, %v5125_v4, %v5126_v16  ;;  %v1077_v15 = vsel %vm1073_vm13, %v5130_v2, %v5131_v6  ;;  %v1076_v10 = vsel %vm1073_vm13, %v5126_v16, %v5130_v2  ;;  %v5796_v16 = vpack.c.bf16 %v585_v59, %v584_v52 }
 0x136   : > { %v1064_v26 = vpop.permute.xlu1 %1063  ;;  %v1040_v25 = vpop.permute.xlu0 %1039  ;;  %v4562_v63 = vpack.c.bf16 %v1075_v55, %v1051_v3  ;;  %v4578_v33 = vpack.c.bf16 %v1077_v15, %v1053_v22  ;;  %v4580_v12 = vpack.c.bf16 %v1076_v10, %v1052_v11  ;;  %v553_v3 = vld [vmem:[%s6976_s7 + $0x88] sm:$0xff]  ;;  %v1106_v15 = vld [vmem:[%s6971_s2] sm:$0xff]  ;;  %v7170_v59 = vmov 0.0  }
 0x137   : > { %v1074_v8 = vsel %vm1073_vm13, %v1064_v26, %v5125_v4  ;;  %v1050_v36 = vsel %vm1049_vm12, %v1040_v25, %v5115_v51  ;;  %v569_v51 = vld [vmem:[%s6976_s7 + $0x108] sm:$0xff]  ;;  %v552_v4 = vld [vmem:[%s6976_s7 + $0x80] sm:$0xff]  ;;  %v5817_v25 = vpack.c.bf16 %v587_v56, %v586_v7  ;;  %v538_v56 = vld [vmem:[%s6976_s7 + $0x10] sm:$0xff] }
 0x138   : > { %v4564_v38 = vpack.c.bf16 %v1074_v8, %v1050_v36  ;;  %4563 = vmatprep.subr.bf16.mxu0 %v4562_v63  ;;  %4579 = vmatprep.subr.bf16.mxu1 %v4578_v33  ;;  %v5809_v11 = vpack.c.bf16 %v569_v51, %v568_v53  ;;  %v536_v10 = vld [vmem:[%s6976_s7] sm:$0xff]  ;;  %v537_v26 = vld [vmem:[%s6976_s7 + $0x8] sm:$0xff]  ;;  %v570_v63 = vld [vmem:[%s6976_s7 + $0x110] sm:$0xff]  ;;  %v5828_v8 = vpack.c.bf16 %v553_v3, %v552_v4 }
 0x139   : > { %4581 = vmatpush1.bf16.msra.mxu1 %v4580_v12  ;;  %v571_v33 = vld [vmem:[%s6976_s7 + $0x118] sm:$0xff]  ;;  %v554_v12 = vld [vmem:[%s6976_s7 + $0x90] sm:$0xff]  ;;  %v1107_v53 = vld [vmem:[%s6971_s2 + $0x8] sm:$0xff]  ;;  %v5847_v51 = vpack.c.bf16 %v537_v26, %v536_v10 }
 0x13a   : > { %v1092_v62 = vpop.permute.xlu1 %1091  ;;  %v1090_v23 = vpop.permute.xlu0 %1089  ;;  %4565 = vmatpush1.bf16.msra.mxu0 %v4564_v38  ;;  %v555_v36 = vld [vmem:[%s6976_s7 + $0x98] sm:$0xff]  ;;  %v588_v38 = vld [vmem:[%s6976_s7 + $0x1a0] sm:$0xff]  ;;  %v5849_v7 = vpack.c.bf16 %v571_v33, %v570_v63  ;;  %v573_v3 = vld [vmem:[%s6976_s7 + $0x128] sm:$0xff] }
 0x13b   : > { %v1099_v43 = vsel %vm1097_vm14, %v1090_v23, %v1092_v62  ;;  %v572_v4 = vld [vmem:[%s6976_s7 + $0x120] sm:$0xff]  ;;  %v590_v10 = vld [vmem:[%s6976_s7 + $0x1b0] sm:$0xff]  ;;  %v591_v26 = vld [vmem:[%s6976_s7 + $0x1b8] sm:$0xff] }
 0x13c   : > { %1131 = vmatprep.subr.mxu0 %v1099_v43  ;;  %v5888_v63 = vpack.c.bf16 %v573_v3, %v572_v4  ;;  %v540_v33 = vld [vmem:[%s6976_s7 + $0x20] sm:$0xff]  ;;  %v593_v4 = vld [vmem:[%s6976_s7 + $0x1c8] sm:$0xff] }
 0x13e   : > { %v1096_v6 = vpop.permute.xlu1 %1095  ;;  %v1094_v2 = vpop.permute.xlu0 %1093  ;;  %7173 = vst [vmem:[#allocation38_spill] sm:$0xff] %v5888_v63 }
 0x13f   : > { %v1101_v22 = vsel %vm1097_vm14, %v1094_v2, %v1096_v6  ;;  %v1100_v55 = vsel %vm1097_vm14, %v1092_v62, %v1094_v2  ;;  %v589_v62 = vld [vmem:[%s6976_s7 + $0x1a8] sm:$0xff]  ;;  %v5858_v6 = vpack.c.bf16 %v555_v36, %v554_v12 }
 0x140   : > { %1208 = vmatprep.subr.mxu1 %v1101_v22  ;;  %v5860_v2 = vpack.c.bf16 %v589_v62, %v588_v38  ;;  %v556_v22 = vld [vmem:[%s6976_s7 + $0xa0] sm:$0xff]  ;;  %v541_v12 = vld [vmem:[%s6976_s7 + $0x28] sm:$0xff]  ;;  %v5900_v38 = vpack.c.bf16 %v591_v26, %v590_v10  ;;  %v574_v62 = vld [vmem:[%s6976_s7 + $0x130] sm:$0xff] }
 0x141   : > { %1209 = vmatpush1.msra.mxu1 %v1100_v55  ;;  %v557_v55 = vld [vmem:[%s6976_s7 + $0xa8] sm:$0xff]  ;;  %v5923_v3 = vpack.c.bf16 %v541_v12, %v540_v33  ;;  %v576_v33 = vld [vmem:[%s6976_s7 + $0x140] sm:$0xff] }
 0x142   : > { %v1088_v43 = vpop.permute.xlu0 %1087  ;;  %4046 = vmatmul.mubr.msk.f32.vlgmr.msra.gmra.mrb[0].mxu1 %vm1108_vm15, %v1106_v15  ;;  %4615 = vmatprep.subr.bf16.mxu1 %v5796_v16  ;;  %7171 = vst [vmem:[#allocation36_spill] sm:$0xff] %v5860_v2  ;;  %v5898_v36 = vpack.c.bf16 %v557_v55, %v556_v22  ;;  %7175 = vst [vmem:[#allocation40_spill] sm:$0xff] %v5900_v38  ;;  %v543_v55 = vld [vmem:[%s6976_s7 + $0x38] sm:$0xff]  ;;  %v577_v12 = vld [vmem:[%s6976_s7 + $0x148] sm:$0xff] }
 0x143   : > { %v1098_v52 = vsel %vm1097_vm14, %v1088_v43, %v1090_v23  ;;  %1262 = vmatprep.mubr.f32.mxu1 %v7170_v59  ;;  %4617 = vmatpush3.bf16.msra.mxu1 %v5809_v11  ;;  %v539_v23 = vld [vmem:[%s6976_s7 + $0x18] sm:$0xff]  ;;  %7176 = vst [vmem:[#allocation41_spill] sm:$0xff] %v5923_v3 }
 0x144   : > { %1132 = vmatpush1.msra.mxu0 %v1098_v52  ;;  %4619 = vmatprep.subr.bf16.mxu1 %v5817_v25  ;;  %7174 = vst [vmem:[#allocation39_spill] sm:$0xff] %v5898_v36  ;;  %v575_v43 = vld [vmem:[%s6976_s7 + $0x138] sm:$0xff]  ;;  %v558_v52 = vld [vmem:[%s6976_s7 + $0xb0] sm:$0xff] }
 0x145   : > { %4044 = vmatmul.mubr.msk.f32.vlgmr.msra.gmra.mrb[0].mxu0 %vm1108_vm15, %v1106_v15  ;;  %4583 = vmatprep.subr.bf16.mxu0 %v5828_v8  ;;  %v5886_v15 = vpack.c.bf16 %v539_v23, %v538_v56  ;;  %v559_v56 = vld [vmem:[%s6976_s7 + $0xb8] sm:$0xff]  ;;  %v592_v23 = vld [vmem:[%s6976_s7 + $0x1c0] sm:$0xff]  ;;  %v5925_v22 = vpack.c.bf16 %v575_v43, %v574_v62  ;;  %v561_v43 = vld [vmem:[%s6976_s7 + $0xc8] sm:$0xff] }
 0x146   : > { %4047 = vmatmul.mubr.msk.f32.gmra.mrb[2].mxu1 %vm1108_vm15, %v1107_v53  ;;  %1185 = vmatprep.mubr.f32.mxu0 %v7170_v59  ;;  %v5935_v10 = vpack.c.bf16 %v559_v56, %v558_v52  ;;  %v5937_v26 = vpack.c.bf16 %v593_v4, %v592_v23  ;;  %v560_v62 = vld [vmem:[%s6976_s7 + $0xc0] sm:$0xff]  ;;  %v594_v52 = vld [vmem:[%s6976_s7 + $0x1d0] sm:$0xff]  ;;  %v595_v56 = vld [vmem:[%s6976_s7 + $0x1d8] sm:$0xff]  ;;  %v5961_v4 = vpack.c.bf16 %v577_v12, %v576_v33 }
 0x147   : > { %4585 = vmatpush3.bf16.msra.mxu0 %v5847_v51  ;;  %4621 = vmatpush3.bf16.msra.mxu1 %v5849_v7  ;;  %7172 = vst [vmem:[#allocation37_spill] sm:$0xff] %v5886_v15  ;;  %7177 = vst [vmem:[#allocation42_spill] sm:$0xff] %v5925_v22  ;;  %v5971_v29 = vpack.c.bf16 %v561_v43, %v560_v62  ;;  %v5973_v61 = vpack.c.bf16 %v595_v56, %v594_v52  ;;  %v562_v33 = vld [vmem:[%s6976_s7 + $0xd0] sm:$0xff]  ;;  %v563_v12 = vld [vmem:[%s6976_s7 + $0xd8] sm:$0xff] }
 0x148   : > { %4587 = vmatprep.subr.bf16.mxu0 %v5858_v6  ;;  %4623 = vmatprep.subr.bf16.mxu1 %v5860_v2  ;;  %7178 = vst [vmem:[#allocation43_spill] sm:$0xff] %v5935_v10  ;;  %7179 = vst [vmem:[#allocation44_spill] sm:$0xff] %v5937_v26  ;;  %v596_v62 = vld [vmem:[%s6976_s7 + $0x1e0] sm:$0xff]  ;;  %v597_v43 = vld [vmem:[%s6976_s7 + $0x1e8] sm:$0xff]  ;;  %v5995_v52 = vpack.c.bf16 %v545_v17, %v544_v30  ;;  %v6004_v24 = vpack.c.bf16 %v563_v12, %v562_v33 }
 0x149   : > { %4045 = vmatmul.mubr.msk.f32.gmra.mrb[2].mxu0 %vm1108_vm15, %v1107_v53  ;;  %v542_v53 = vld [vmem:[%s6976_s7 + $0x30] sm:$0xff]  ;;  %7181 = vst [vmem:[#allocation46_spill] sm:$0xff] %v5961_v4  ;;  %7182 = vst [vmem:[#allocation47_spill] sm:$0xff] %v5971_v29  ;;  %v6009_v49 = vpack.c.bf16 %v597_v43, %v596_v62  ;;  %v580_v17 = vld [vmem:[%s6976_s7 + $0x160] sm:$0xff] }
 0x14a   : > { %v5959_v23 = vpack.c.bf16 %v543_v55, %v542_v53  ;;  %7183 = vst [vmem:[#allocation48_spill] sm:$0xff] %v5973_v61  ;;  %v578_v53 = vld [vmem:[%s6976_s7 + $0x150] sm:$0xff]  ;;  %v579_v55 = vld [vmem:[%s6976_s7 + $0x158] sm:$0xff]  ;;  %7184 = vst [vmem:[#allocation49_spill] sm:$0xff] %v5995_v52 }
 0x14b   : > { %4589 = vmatpush3.bf16.msra.mxu0 %v5886_v15  ;;  %4625 = vmatpush3.bf16.msra.mxu1 %v5888_v63  ;;  %v5997_v56 = vpack.c.bf16 %v579_v55, %v578_v53  ;;  %7186 = vst [vmem:[#allocation51_spill] sm:$0xff] %v6004_v24  ;;  %7187 = vst [vmem:[#allocation52_spill] sm:$0xff] %v6009_v49  ;;  %v581_v30 = vld [vmem:[%s6976_s7 + $0x168] sm:$0xff]  ;;  %v6019_v53 = vpack.c.bf16 %v547_v0, %v546_v37  ;;  %v564_v33 = vld [vmem:[%s6976_s7 + $0xe0] sm:$0xff] }
 0x14c   : > { %4591 = vmatprep.subr.bf16.mxu0 %v5898_v36  ;;  %4627 = vmatprep.subr.bf16.mxu1 %v5900_v38  ;;  %7180 = vst [vmem:[#allocation45_spill] sm:$0xff] %v5959_v23  ;;  %v6021_v55 = vpack.c.bf16 %v581_v30, %v580_v17  ;;  %v565_v12 = vld [vmem:[%s6976_s7 + $0xe8] sm:$0xff]  ;;  %v548_v37 = vld [vmem:[%s6976_s7 + $0x60] sm:$0xff]  ;;  %v598_v43 = vld [vmem:[%s6976_s7 + $0x1f0] sm:$0xff] }
 0x14d   : > { %7185 = vst [vmem:[#allocation50_spill] sm:$0xff] %v5997_v56  ;;  %7188 = vst [vmem:[#allocation53_spill] sm:$0xff] %v6019_v53  ;;  %v6033_v0 = vpack.c.bf16 %v565_v12, %v564_v33  ;;  %v549_v62 = vld [vmem:[%s6976_s7 + $0x68] sm:$0xff]  ;;  %v599_v30 = vld [vmem:[%s6976_s7 + $0x1f8] sm:$0xff] }
 0x14e   : > { %7189 = vst [vmem:[#allocation54_spill] sm:$0xff] %v6021_v55  ;;  %v6044_v17 = vpack.c.bf16 %v549_v62, %v548_v37  ;;  %v582_v33 = vld [vmem:[%s6976_s7 + $0x170] sm:$0xff]  ;;  %v583_v12 = vld [vmem:[%s6976_s7 + $0x178] sm:$0xff]  ;;  %v6056_v34 = vpack.c.bf16 %v599_v30, %v598_v43 }
 0x14f   : > { %4593 = vmatpush3.bf16.msra.mxu0 %v5923_v3  ;;  %4629 = vmatpush3.bf16.msra.mxu1 %v5925_v22  ;;  %7190 = vst [vmem:[#allocation55_spill] sm:$0xff] %v6033_v0  ;;  %v6058_v39 = vpack.c.bf16 %v583_v12, %v582_v33  ;;  %v566_v37 = vld [vmem:[%s6976_s7 + $0xf0] sm:$0xff]  ;;  %v567_v62 = vld [vmem:[%s6976_s7 + $0xf8] sm:$0xff] }
 0x150   : > { %4595 = vmatprep.subr.bf16.mxu0 %v5935_v10  ;;  %4631 = vmatprep.subr.bf16.mxu1 %v5937_v26  ;;  %7191 = vst [vmem:[#allocation56_spill] sm:$0xff] %v6044_v17  ;;  %7192 = vst [vmem:[#allocation57_spill] sm:$0xff] %v6056_v34  ;;  %v6068_v35 = vpack.c.bf16 %v567_v62, %v566_v37  ;;  %v550_v43 = vld [vmem:[%s6976_s7 + $0x70] sm:$0xff]  ;;  %v551_v30 = vld [vmem:[%s6976_s7 + $0x78] sm:$0xff] }
 0x151   : > { %7193 = vst [vmem:[#allocation58_spill] sm:$0xff] %v6058_v39  ;;  %v6077_v33 = vpack.c.bf16 %v551_v30, %v550_v43 }
 0x152   : > { %7194 = vst [vmem:[#allocation59_spill] sm:$0xff] %v6068_v35 }
 0x153   : > { %4597 = vmatpush3.bf16.msra.mxu0 %v5959_v23  ;;  %4633 = vmatpush3.bf16.msra.mxu1 %v5961_v4  ;;  %7195 = vst [vmem:[#allocation60_spill] sm:$0xff] %v6077_v33 }
 0x154   : > { %4599 = vmatprep.subr.bf16.mxu0 %v5971_v29  ;;  %4635 = vmatprep.subr.bf16.mxu1 %v5973_v61 }
 0x157   : > { %4601 = vmatpush3.bf16.msra.mxu0 %v5995_v52  ;;  %4637 = vmatpush3.bf16.msra.mxu1 %v5997_v56 }
 0x158   : > { %4603 = vmatprep.subr.bf16.mxu0 %v6004_v24  ;;  %4639 = vmatprep.subr.bf16.mxu1 %v6009_v49 }
 0x15b   : > { %4605 = vmatpush3.bf16.msra.mxu0 %v6019_v53  ;;  %4641 = vmatpush3.bf16.msra.mxu1 %v6021_v55 }
 0x15c   : > { %4607 = vmatprep.subr.bf16.mxu0 %v6033_v0  ;;  %4643 = vmatprep.subr.bf16.mxu1 %v6056_v34 }
 0x15f   : > { %4609 = vmatpush3.bf16.msra.mxu0 %v6044_v17  ;;  %4645 = vmatpush3.bf16.msra.mxu1 %v6058_v39 }
 0x160   : > { %4611 = vmatprep.subr.bf16.mxu0 %v6068_v35 }
 0x163   : > { %4613 = vmatpush3.bf16.msra.mxu0 %v6077_v33 }
 0x215   : > { %v6081_v12 = vpop.f32.mrb[0].mxu1 }
 0x216   : > { %v7048_v37 = vmax.f32 %v6081_v12, 0.0  ;;  %v6084_v62 = vpop.f32.mrb[1].mxu1 }
 0x217   : > { %v7047_v42 = vmax.f32 %v6084_v62, 0.0 }
 0x218   : > { %v6087_v5 = vpop.f32.mrb[0].mxu0 }
 0x219   : > { %v6089_v9 = vpop.f32.mrb[1].mxu0  ;;  %v6091_v21 = vpop.f32.mrb[2].mxu1  ;;  %1422 = vmatprep.mubr.f32.mxu1 %v7047_v42  ;;  %v7052_v40 = vmax.f32 %v6087_v5, 0.0 }
 0x21a   : > { %v7049_v43 = vmax.f32 %v6089_v9, 0.0  ;;  %v7051_v30 = vmax.f32 %v6091_v21, 0.0  ;;  %v6097_v20 = vpop.f32.mrb[3].mxu1  ;;  %1423 = vmatmul.mubr.f32.vlgmr.msra.gmra.mrb[4].mxu1 %v7048_v37 }
 0x21b   : > { %v7050_v46 = vmax.f32 %v6097_v20, 0.0 }
 0x21c   : > { %v6103_v41 = vpop.f32.mrb[2].mxu0  ;;  %1347 = vmatprep.mubr.f32.mxu0 %v7049_v43  ;;  %v6125_v43 = vld [vmem:[%s6973_s4] sm:$0xff] }
 0x21d   : > { %v6107_v47 = vpop.f32.mrb[3].mxu0  ;;  %1348 = vmatmul.mubr.f32.vlgmr.msra.gmra.mrb[4].mxu0 %v7052_v40  ;;  %1427 = vmatprep.mubr.f32.mxu1 %v7050_v46  ;;  %v7068_v37 = vmax.f32 %v6103_v41, 0.0 }
 0x21e   : > { %v7063_v42 = vmax.f32 %v6107_v47, 0.0  ;;  %1428 = vmatmul.mubr.f32.gmra.mrb[6].mxu1 %v7051_v30 }
 0x21f   : > { %1613 = vmatprep.mubr.f32.mxu1 %v7170_v59 }
 0x220   : > { %1352 = vmatprep.mubr.f32.mxu0 %v7063_v42 }
 0x221   : > { %1353 = vmatmul.mubr.f32.gmra.mrb[6].mxu0 %v7068_v37 }
 0x222   : > { %4540 = vmatprep.mubr.msk.f32.mxu0 %vm756_vm3, %v6125_v43 }
 0x2ed   : > { %v4166_v46 = vpop.f32.mrb[4].mxu1 }
 0x2ee   : > { %v4167_v30 = vpop.f32.mrb[5].mxu1 }
 0x2ef   : > { %v4168_v40 = vadd.f32 %v4167_v30, %v4166_v46  ;;  %v5346_v46 = vmov 1983009808  }
 0x2f0   : > { %v4128_v45 = vpop.f32.mrb[4].mxu0 }
 0x2f1   : > { %v4129_v48 = vpop.f32.mrb[5].mxu0  ;;  %v4169_v27 = vpop.f32.mrb[6].mxu1 }
 0x2f2   : > { %v4130_v28 = vadd.f32 %v4129_v48, %v4128_v45  ;;  %v4170_v32 = vpop.f32.mrb[7].mxu1 }
 0x2f3   : > { %v4171_v42 = vadd.f32 %v4170_v32, %v4169_v27  ;;  %v1519_v27 = vunpack.c.l.s4 %v5346_v46  ;;  %v600_v32 = vld [vmem:[%s6977_s8] sm:$0xff]  ;;  %v7200_v46 = vmax.f32 %v6087_v5, 0.0 }
 0x2f4   : > { %v1425_v31 = vadd.f32 %v4168_v40, %v4130_v28  ;;  %v4131_v44 = vpop.f32.mrb[6].mxu0 }
 0x2f5   : > { %v4132_v37 = vpop.f32.mrb[7].mxu0  ;;  %v1520_v28 = vunpack.c.0.s8 %v1519_v27 }
 0x2f6   : > { %v4133_v60 = vadd.f32 %v4132_v37, %v4131_v44 }
 0x2f8   : > { %v1430_v13 = vadd.f32 %v4171_v42, %v4133_v60 }
 0x2fa   : > { %v4646_v18 = vpack.c.bf16 %v1430_v13, %v1425_v31  ;;  %v1523_v13 = vsub.s32 %v1520_v28, %v5436_v1  ;;  %v7201_v28 = vmax.f32 %v6081_v12, 0.0 }
 0x2fc   : > { %4647 = vmatprep.subr.bf16.mxu0 %v4646_v18  ;;  %v6141_v31 = vrot.slane %v600_v32, %v1523_v13 }
 0x2fd   : > { %4649 = vmatpush3.bf16.msra.mxu0 %v4646_v18  ;;  %v1517_v18 = vcombine.high %v600_v32, %v600_v32 }
 0x2fe   : > { %7196 = vst [vmem:[#allocation61_spill] sm:$0xff] %v6141_v31  ;;  %v6147_v42 = vcombine.high %v6141_v31, %v6141_v31 }
 0x2ff   : > { %v6143_v40 = vrot.slane %v1517_v18, %v1523_v13 }
 0x300   : > { %4541 = vmatmul.mubr.msk.f32.vlgmr.msra.gmra.mrb[8].mxu0 %vm756_vm3, %v6132_v14  ;;  %7198 = vst [vmem:[#allocation63_spill] sm:$0xff] %v6147_v42  ;;  %4050 = vmatprep.subr.msk.mxu1 %vm1540_vm0, %v6147_v42 }
 0x301   : > { %1690 = vmatprep.mubr.f32.mxu0 %v7170_v59  ;;  %7197 = vst [vmem:[#allocation62_spill] sm:$0xff] %v6143_v40  ;;  %v6151_v44 = vcombine.high %v6143_v40, %v6143_v40  ;;  %4051 = vmatpush1.msk.msra.mxu1 %vm1540_vm0, %v6141_v31 }
 0x302   : > { %4651 = vmatprep.subr.bf16.mxu1 %v5828_v8 }
 0x303   : > { %7199 = vst [vmem:[#allocation64_spill] sm:$0xff] %v6151_v44  ;;  %4054 = vmatprep.subr.msk.mxu0 %vm1540_vm0, %v6151_v44 }
 0x304   : > { %4055 = vmatpush1.msk.msra.mxu0 %vm1540_vm0, %v6143_v40 }
 0x305   : > { %4683 = vmatprep.subr.bf16.mxu0 %v5796_v16 }
 0x3d3   : > { %v4542_v1 = vpop.f32.mrb[8].mxu0 }
 0x3d4   : > { %v1505_v45 = vpop.f32.mrb[9].mxu0  ;;  %v1515_v60 = vmul.f32 0.001953125, %v4542_v1  ;;  %v7202_v1 = vmax.f32 %v6089_v9, 0.0 }
 0x3d5   : > { %v1514_v48 = vmul.f32 0.001953125, %v1505_v45 }
 0x3d7   : > { %4052 = vmatmul.mubr.msk.f32.vlgmr.msra.gmra.mrb[8].mxu1 %vm714_vm2, %v1514_v48  ;;  %4056 = vmatmul.mubr.msk.f32.vlgmr.msra.gmra.mrb[10].mxu0 %vm714_vm2, %v1514_v48  ;;  %v7203_v48 = vmax.f32 %v6084_v62, 0.0  ;;  %v7205_v62 = vmax.f32 %v6091_v21, 0.0 }
 0x3d8   : > { %1619 = vmatprep.mubr.f32.mxu1 %v7170_v59  ;;  %1696 = vmatprep.mubr.f32.mxu0 %v7170_v59 }
 0x3d9   : > { %4653 = vmatpush3.bf16.msra.mxu1 %v5847_v51  ;;  %4685 = vmatpush3.bf16.msra.mxu0 %v5809_v11 }
 0x3da   : > { %4655 = vmatprep.subr.bf16.mxu1 %v5858_v6  ;;  %4687 = vmatprep.subr.bf16.mxu0 %v5817_v25 }
 0x3db   : > { %4053 = vmatmul.mubr.msk.f32.gmra.mrb[10].mxu1 %vm714_vm2, %v1515_v60  ;;  %4057 = vmatmul.mubr.msk.f32.gmra.mrb[12].mxu0 %vm714_vm2, %v1515_v60 }
 0x3dd   : > { %4657 = vmatpush3.bf16.msra.mxu1 %v5886_v15  ;;  %4689 = vmatpush3.bf16.msra.mxu0 %v5849_v7  ;;  %v7240_v15 = vld [vmem:[#allocation12_spill] sm:$0xff] }
 0x3de   : > { %4659 = vmatprep.subr.bf16.mxu1 %v5898_v36  ;;  %4691 = vmatprep.subr.bf16.mxu0 %v5860_v2  ;;  %v7237_v36 = vld [vmem:[#allocation3_spill] sm:$0xff] }
 0x3e1   : > { %4661 = vmatpush3.bf16.msra.mxu1 %v5923_v3  ;;  %4693 = vmatpush3.bf16.msra.mxu0 %v5888_v63 }
 0x3e2   : > { %4663 = vmatprep.subr.bf16.mxu1 %v5935_v10  ;;  %4695 = vmatprep.subr.bf16.mxu0 %v5900_v38 }
 0x3e5   : > { %4665 = vmatpush3.bf16.msra.mxu1 %v5959_v23  ;;  %4697 = vmatpush3.bf16.msra.mxu0 %v5925_v22 }
 0x3e6   : > { %4667 = vmatprep.subr.bf16.mxu1 %v5971_v29  ;;  %4699 = vmatprep.subr.bf16.mxu0 %v5937_v26  ;;  %v7222_v29 = vld [vmem:[#allocation14_spill] sm:$0xff] }
 0x3e9   : > { %4669 = vmatpush3.bf16.msra.mxu1 %v5995_v52  ;;  %4701 = vmatpush3.bf16.msra.mxu0 %v5961_v4  ;;  %v7216_v52 = vld [vmem:[#allocation9_spill] sm:$0xff] }
 0x3ea   : > { %4671 = vmatprep.subr.bf16.mxu1 %v6004_v24  ;;  %4703 = vmatprep.subr.bf16.mxu0 %v5973_v61  ;;  %v7215_v24 = vld [vmem:[#allocation11_spill] sm:$0xff] }
 0x3ed   : > { %4673 = vmatpush3.bf16.msra.mxu1 %v6019_v53  ;;  %4705 = vmatpush3.bf16.msra.mxu0 %v5997_v56 }
 0x3ee   : > { %4675 = vmatprep.subr.bf16.mxu1 %v6033_v0  ;;  %4707 = vmatprep.subr.bf16.mxu0 %v6009_v49  ;;  %v7214_v0 = vld [vmem:[#allocation10_spill] sm:$0xff] }
 0x3f1   : > { %4677 = vmatpush3.bf16.msra.mxu1 %v6044_v17  ;;  %4709 = vmatpush3.bf16.msra.mxu0 %v6021_v55 }
 0x3f2   : > { %4679 = vmatprep.subr.bf16.mxu1 %v6068_v35  ;;  %4711 = vmatprep.subr.bf16.mxu0 %v6056_v34 }
 0x3f5   : > { %4681 = vmatpush3.bf16.msra.mxu1 %v6077_v33  ;;  %4713 = vmatpush3.bf16.msra.mxu0 %v6058_v39  ;;  %v7207_v39 = vmax.f32 %v6097_v20, 0.0 }
 0x3f6   : > { %4060 = vmatprep.subr.msk.mxu0 %vm1540_vm0, %v6147_v42 }
 0x4aa   : > { %v1615_v37 = vpop.f32.mrb[8].mxu1  ;;  %v1692_v30 = vpop.f32.mrb[10].mxu0 }
 0x4ab   : > { %v6203_v27 = vsub.f32 %v7200_v46, %v1615_v37  ;;  %v6207_v32 = vsub.f32 %v7201_v28, %v1692_v30  ;;  %v1617_v13 = vpop.f32.mrb[9].mxu1  ;;  %v1694_v18 = vpop.f32.mrb[11].mxu0  ;;  %v7204_v46 = vmax.f32 %v6103_v41, 0.0 }
 0x4ac   : > { %v6211_v45 = vsub.f32 %v7202_v1, %v1617_v13  ;;  %v6215_v60 = vsub.f32 %v7203_v48, %v1694_v18  ;;  %v7206_v48 = vmax.f32 %v6107_v47, 0.0 }
 0x4ad   : > { %v1711_v30 = vmul.f32 %v6203_v27, %v6203_v27  ;;  %v1713_v9 = vmul.f32 %v6207_v32, %v6207_v32 }
 0x4ae   : > { %v1712_v42 = vmul.f32 %v6211_v45, %v6211_v45  ;;  %v1714_v5 = vmul.f32 %v6215_v60, %v6215_v60  ;;  %v1621_v37 = vpop.f32.mrb[10].mxu1  ;;  %v1698_v12 = vpop.f32.mrb[12].mxu0 }
 0x4af   : > { %v6227_v28 = vsub.f32 %v7204_v46, %v1621_v37  ;;  %v6231_v13 = vsub.f32 %v7205_v62, %v1698_v12  ;;  %v1623_v18 = vpop.f32.mrb[11].mxu1  ;;  %v1700_v1 = vpop.f32.mrb[13].mxu0  ;;  %v1281_v37 = vld [vmem:[%s6979_s10] sm:$0xff] }
 0x4b0   : > { %v6235_v33 = vsub.f32 %v7206_v48, %v1623_v18  ;;  %v6239_v35 = vsub.f32 %v7207_v39, %v1700_v1  ;;  %1783 = vmatprep.mubr.f32.mxu1 %v1712_v42  ;;  %1858 = vmatprep.mubr.f32.mxu0 %v1714_v5  ;;  %v1279_v39 = vld [vmem:[%s6978_s9] sm:$0xff]  ;;  %v1280_v42 = vld [vmem:[%s6978_s9 + $0x8] sm:$0xff]  ;;  %v5347_v5 = vmov 0  }
 0x4b1   : > { %1784 = vmatmul.mubr.f32.vlgmr.msra.gmra.mrb[12].mxu1 %v1711_v30  ;;  %1859 = vmatmul.mubr.f32.vlgmr.msra.gmra.mrb[14].mxu0 %v1713_v9  ;;  %v1715_v47 = vmul.f32 %v6227_v28, %v6227_v28  ;;  %v1717_v20 = vmul.f32 %v6231_v13, %v6231_v13 }
 0x4b2   : > { %v1716_v41 = vmul.f32 %v6235_v33, %v6235_v33  ;;  %v1718_v21 = vmul.f32 %v6239_v35, %v6239_v35  ;;  %4061 = vmatpush1.msk.msra.mxu0 %vm1540_vm0, %v6141_v31  ;;  %5132 = vset.pattern.permute.xlu1 %v5347_v5 }
 0x4b3   : > { %5133 = vset.pattern.permute.xlu0 %v5347_v5  ;;  %1952 = vperm.xlu1 %5132, %v1279_v39  }
 0x4b4   : > { %1788 = vmatprep.mubr.f32.mxu1 %v1716_v41  ;;  %1863 = vmatprep.mubr.f32.mxu0 %v1718_v21 }
 0x4b5   : > { %1789 = vmatmul.mubr.f32.gmra.mrb[14].mxu1 %v1715_v47  ;;  %1864 = vmatmul.mubr.f32.gmra.mrb[16].mxu0 %v1717_v20 }
 0x4b6   : > { %4547 = vmatprep.mubr.msk.f32.mxu1 %vm756_vm3, %v6125_v43  ;;  %2032 = vmatprep.mubr.f32.mxu0 %v7170_v59  ;;  %v1282_v43 = vld [vmem:[%s6979_s10 + $0x8] sm:$0xff] }
 0x4b7   : > { %1957 = vperm.xlu0 %5133, %v1280_v42   ;;  %2132 = vperm.xlu1 %5132, %v1281_v37  }
 0x4bb   : > { %2137 = vperm.xlu1 %5132, %v1282_v43  }
 0x584   : > { %v4208_v12 = vpop.f32.mrb[12].mxu1  ;;  %v4246_v30 = vpop.f32.mrb[14].mxu0 }
 0x585   : > { %v4209_v9 = vpop.f32.mrb[13].mxu1  ;;  %v4247_v46 = vpop.f32.mrb[15].mxu0 }
 0x586   : > { %v4210_v62 = vadd.f32 %v4209_v9, %v4208_v12  ;;  %v4248_v18 = vadd.f32 %v4247_v46, %v4246_v30 }
 0x588   : > { %v1861_v1 = vadd.f32 %v4248_v18, %v4210_v62  ;;  %v4211_v48 = vpop.f32.mrb[14].mxu1  ;;  %v4249_v41 = vpop.f32.mrb[16].mxu0 }
 0x589   : > { %v4212_v21 = vpop.f32.mrb[15].mxu1  ;;  %v4250_v47 = vpop.f32.mrb[17].mxu0 }
 0x58a   : > { %v4213_v20 = vadd.f32 %v4212_v21, %v4211_v48  ;;  %v4251_v39 = vadd.f32 %v4250_v47, %v4249_v41  ;;  %v1953_v18 = vpop.permute.xlu1 %1952  ;;  %v1958_v41 = vpop.permute.xlu0 %1957 }
 0x58c   : > { %v1866_v42 = vadd.f32 %v4251_v39, %v4213_v20 }
 0x58e   : > { %v4714_v5 = vpack.c.bf16 %v1866_v42, %v1861_v1  ;;  %v2133_v21 = vpop.permute.xlu1 %2132 }
 0x590   : > { %4715 = vmatprep.subr.bf16.mxu1 %v4714_v5 }
 0x591   : > { %4717 = vmatpush3.bf16.msra.mxu1 %v4714_v5 }
 0x592   : > { %4064 = vmatprep.subr.msk.mxu1 %vm1540_vm0, %v6151_v44  ;;  %v7212_v44 = vld [vmem:[#allocation35_spill] sm:$0xff] }
 0x594   : > { %4548 = vmatmul.mubr.msk.f32.vlgmr.msra.gmra.mrb[16].mxu1 %vm756_vm3, %v6132_v14 }
 0x595   : > { %4065 = vmatpush1.msk.msra.mxu1 %vm1540_vm0, %v6143_v40  ;;  %2109 = vmatprep.mubr.f32.mxu1 %v7170_v59 }
 0x667   : > { %v4549_v37 = vpop.f32.mrb[16].mxu1 }
 0x668   : > { %v1945_v43 = vmul.f32 0.001953125, %v4549_v37  ;;  %v1935_v12 = vpop.f32.mrb[17].mxu1 }
 0x669   : > { %v1944_v30 = vmul.f32 0.001953125, %v1935_v12 }
 0x66a   : > { %v1947_v9 = vadd.f32 1e-05, %v1945_v43 }
 0x66b   : > { %v1946_v46 = vadd.f32 1e-05, %v1944_v30 }
 0x66d   : > { %5310 = vrsqrt.f32 %v1946_v46 }
 0x66e   : > { %5312 = vrsqrt.f32 %v1947_v9 }
 0x677   : > { %v5311_v62 = vpop.eup %5310 }
 0x678   : > { %v1960_v1 = vmul.f32 %v5311_v62, %v1953_v18  ;;  %v5313_v48 = vpop.eup %5312 }
 0x679   : > { %v1961_v14 = vmul.f32 %v5313_v48, %v1958_v41 }
 0x67a   : > { %4062 = vmatmul.mubr.msk.f32.vlgmr.msra.gmra.mrb[18].mxu0 %vm714_vm2, %v1960_v1  ;;  %4066 = vmatmul.mubr.msk.f32.vlgmr.msra.gmra.mrb[18].mxu1 %vm714_vm2, %v1960_v1 }
 0x67b   : > { %2038 = vmatprep.mubr.f32.mxu0 %v7170_v59  ;;  %2115 = vmatprep.mubr.f32.mxu1 %v7170_v59 }
 0x67e   : > { %4063 = vmatmul.mubr.msk.f32.gmra.mrb[20].mxu0 %vm714_vm2, %v1961_v14  ;;  %4067 = vmatmul.mubr.msk.f32.gmra.mrb[20].mxu1 %vm714_vm2, %v1961_v14 }
 0x74d   : > { %v2034_v47 = vpop.f32.mrb[18].mxu0  ;;  %v2111_v20 = vpop.f32.mrb[18].mxu1 }
 0x74e   : > { %v2122_v39 = vmul.f32 %v2034_v47, %v6203_v27  ;;  %v2036_v42 = vpop.f32.mrb[19].mxu0  ;;  %v2113_v5 = vpop.f32.mrb[19].mxu1  ;;  %v2124_v12 = vmul.f32 %v2111_v20, %v6207_v32 }
 0x74f   : > { %v2123_v37 = vmul.f32 %v2036_v42, %v6211_v45  ;;  %v2125_v9 = vmul.f32 %v2113_v5, %v6215_v60  ;;  %v2138_v45 = vpop.permute.xlu1 %2137 }
 0x750   : > { %v6281_v43 = vadd.f32 %v2133_v21, %v2122_v39  ;;  %v6295_v60 = vadd.f32 %v2133_v21, %v2124_v12 }
 0x751   : > { %v6284_v30 = vadd.f32 %v2133_v21, %v2123_v37  ;;  %v2040_v46 = vpop.f32.mrb[20].mxu0  ;;  %v2117_v62 = vpop.f32.mrb[20].mxu1 }
 0x752   : > { %v2126_v18 = vmul.f32 %v2040_v46, %v6227_v28  ;;  %v2128_v1 = vmul.f32 %v2117_v62, %v6231_v13  ;;  %v2119_v48 = vpop.f32.mrb[21].mxu1  ;;  %2156 = vrot.lane.b32.xlu0 %v6281_v43, %s5330_s24  ;;  %v2042_v27 = vpop.f32.mrb[21].mxu0  ;;  %v6301_v13 = vadd.f32 %v2133_v21, %v2125_v9 }
 0x753   : > { %v2129_v41 = vmul.f32 %v2119_v48, %v6239_v35  ;;  %v2127_v32 = vmul.f32 %v2042_v27, %v6235_v33  ;;  %2158 = vrot.lane.b32.xlu1 %v6284_v30, %s5330_s24  ;;  %v7209_v33 = vld [vmem:[#allocation6_spill] sm:$0xff] }
 0x754   : > { %v6297_v14 = vadd.f32 %v2138_v45, %v2126_v18  ;;  %v6299_v28 = vadd.f32 %v2138_v45, %v2128_v1 }
 0x755   : > { %v6303_v47 = vadd.f32 %v2138_v45, %v2129_v41  ;;  %v6305_v20 = vadd.f32 %v2138_v45, %v2127_v32 }
 0x756   : > { %2160 = vrot.lane.b32.xlu0 %v6295_v60, %s5330_s24 }
 0x757   : > { %2162 = vrot.lane.b32.xlu1 %v6301_v13, %s5330_s24 }
 0x75a   : > { %2164 = vrot.lane.b32.xlu0 %v6297_v14, %s5330_s24 }
 0x75b   : > { %2166 = vrot.lane.b32.xlu1 %v6305_v20, %s5330_s24 }
 0x75e   : > { %2168 = vrot.lane.b32.xlu0 %v6299_v28, %s5330_s24 }
 0x75f   : > { %2170 = vrot.lane.b32.xlu1 %v6303_v47, %s5330_s24  ;;  %s7210_s24 = smov 127  }
 0x7c4   : > { %v2157_v42 = vpop.permute.xlu0 %2156 }
 0x7c5   : > { %v2159_v5 = vpop.permute.xlu1 %2158  ;;  %v6354_v39 = vsel %vm613_vm1, 0.0, %v2157_v42 }
 0x7c6   : > { %v6328_v37 = vsel %vm613_vm1, %v2157_v42, %v2159_v5  ;;  %v7213_v42 = vld [vmem:[#allocation32_spill] sm:$0xff] }
 0x7c7   : > { %v2201_v1 = vmul.f32 %v6328_v37, %v5531_v50  ;;  %v2193_v17 = vmul.f32 %v6328_v37, %v7213_v42 }
 0x7c8   : > { %v2161_v12 = vpop.permute.xlu0 %2160 }
 0x7c9   : > { %v6331_v9 = vsel %vm613_vm1, %v2159_v5, %v2161_v12  ;;  %v2163_v46 = vpop.permute.xlu1 %2162 }
 0x7ca   : > { %v6334_v62 = vsel %vm613_vm1, %v2161_v12, %v2163_v46  ;;  %v6337_v18 = vsel %vm613_vm1, %v2163_v46, 0.0  ;;  %v2202_v48 = vmul.f32 %v6331_v9, %v5547_v57  ;;  %v7208_v12 = vld [vmem:[#allocation5_spill] sm:$0xff]  ;;  %v2212_v35 = vmul.f32 %v6331_v9, %v7209_v33 }
 0x7cb   : > { %v2203_v27 = vmul.f32 %v6334_v62, %v5550_v58  ;;  %v2204_v45 = vmul.f32 %v6337_v18, %v5542_v54  ;;  %v2213_v5 = vmul.f32 %v6334_v62, %v5582_v19  ;;  %v2214_v46 = vmul.f32 %v6337_v18, %v7208_v12 }
 0x7cc   : > { %v2165_v41 = vpop.permute.xlu0 %2164  ;;  %v5134_v32 = vpack.i.bf16 %v2202_v48, %v2201_v1  ;;  %v7211_v1 = vld [vmem:[#allocation4_spill] sm:$0xff]  ;;  %v2222_v49 = vmul.f32 %v6331_v9, %v7214_v0  ;;  %v2223_v61 = vmul.f32 %v6334_v62, %v7215_v24  ;;  %v2234_v26 = vmul.f32 %v6337_v18, %v7222_v29 }
 0x7cd   : > { %v6357_v21 = vsel %vm613_vm1, 0.0, %v2165_v41  ;;  %v2167_v59 = vpop.permute.xlu1 %2166  ;;  %v5139_v31 = vpack.i.bf16 %v2204_v45, %v2203_v27  ;;  %v2211_v48 = vmul.f32 %v6328_v37, %v7211_v1  ;;  %v5149_v45 = vpack.i.bf16 %v2214_v46, %v2213_v5  ;;  %v7218_v5 = vld [vmem:[#allocation8_spill] sm:$0xff]  ;;  %v7219_v46 = vld [vmem:[#allocation34_spill] sm:$0xff] }
 0x7ce   : > { %v6360_v40 = vsel %vm613_vm1, %v2165_v41, %v2167_v59  ;;  %5135 = vrot.lane.b32.xlu0 %v5134_v32, %s7210_s24  ;;  %v2196_v34 = vmul.f32 %v6357_v21, %v7212_v44  ;;  %v2192_v32 = vmul.f32 %v6354_v39, %v7212_v44  ;;  %v2215_v2 = vmul.f32 %v6357_v21, %v7237_v36 }
 0x7cf   : > { %5140 = vrot.lane.b32.xlu1 %v5139_v31, %s7210_s24  ;;  %v2197_v55 = vmul.f32 %v6360_v40, %v7213_v42  ;;  %v5144_v41 = vpack.i.bf16 %v2212_v35, %v2211_v48  ;;  %v2224_v42 = vmul.f32 %v6337_v18, %v7216_v52 }
 0x7d0   : > { %v2169_v27 = vpop.permute.xlu0 %2168  ;;  %v4720_v44 = vpack.c.bf16 %v2196_v34, %v2192_v32  ;;  %v2194_v34 = vmul.f32 %v6331_v9, %v7219_v46 }
 0x7d1   : > { %v6377_v53 = vsel %vm613_vm1, %v2167_v59, %v2169_v27  ;;  %v6379_v56 = vpop.permute.xlu1 %2170  ;;  %v4718_v31 = vpack.c.bf16 %v2197_v55, %v2193_v17  ;;  %v2221_v59 = vmul.f32 %v6328_v37, %v7218_v5  ;;  %v7220_v55 = vld [vmem:[#allocation33_spill] sm:$0xff]  ;;  %v5159_v23 = vpack.i.bf16 %v2224_v42, %v2223_v61  ;;  %v7228_v42 = vld [vmem:[#allocation19_spill] sm:$0xff] }
 0x7d2   : > { %v6387_v35 = vsel %vm613_vm1, %v2169_v27, %v6379_v56  ;;  %5150 = vrot.lane.b32.xlu0 %v5149_v45, %s7217_s27  ;;  %v2198_v48 = vmul.f32 %v6377_v53, %v7219_v46  ;;  %v2195_v17 = vmul.f32 %v6334_v62, %v7220_v55  ;;  %v7221_v45 = vld [vmem:[#allocation16_spill] sm:$0xff]  ;;  %v7227_v61 = vld [vmem:[#allocation21_spill] sm:$0xff] }
 0x7d3   : > { %5145 = vrot.lane.b32.xlu1 %v5144_v41, %s7217_s27  ;;  %4719 = vmatprep.subr.bf16.mxu0 %v4718_v31  ;;  %v2199_v4 = vmul.f32 %v6387_v35, %v7220_v55  ;;  %v5154_v27 = vpack.i.bf16 %v2222_v49, %v2221_v59  ;;  %v2233_v32 = vmul.f32 %v6334_v62, %v7221_v45  ;;  %v7223_v31 = vld [vmem:[#allocation15_spill] sm:$0xff]  ;;  %v7225_v49 = vld [vmem:[#allocation13_spill] sm:$0xff]  ;;  %v7226_v46 = vld [vmem:[#allocation20_spill] sm:$0xff] }
 0x7d4   : > { %4721 = vmatpush1.bf16.msra.mxu0 %v4720_v44  ;;  %v2232_v22 = vmul.f32 %v6331_v9, %v7223_v31  ;;  %v4756_v10 = vpack.c.bf16 %v2198_v48, %v2194_v34  ;;  %v2231_v44 = vmul.f32 %v6328_v37, %v7225_v49  ;;  %v2242_v55 = vmul.f32 %v6331_v9, %v7226_v46  ;;  %v7230_v48 = vld [vmem:[#allocation18_spill] sm:$0xff]  ;;  %v7232_v34 = vld [vmem:[#allocation24_spill] sm:$0xff] }
 0x7d5   : > { %v4754_v41 = vpack.c.bf16 %v2199_v4, %v2195_v17  ;;  %v5169_v59 = vpack.i.bf16 %v2234_v26, %v2233_v32  ;;  %v2243_v4 = vmul.f32 %v6334_v62, %v7227_v61  ;;  %v2244_v17 = vmul.f32 %v6337_v18, %v7228_v42 }
 0x7d6   : > { %5155 = vrot.lane.b32.xlu0 %v5154_v27, %s7224_s28  ;;  %v5164_v38 = vpack.i.bf16 %v2232_v22, %v2231_v44  ;;  %v2254_v22 = vmul.f32 %v6337_v18, %v7232_v34 }
 0x7d7   : > { %5160 = vrot.lane.b32.xlu1 %v5159_v23, %s7224_s28  ;;  %4755 = vmatprep.subr.bf16.mxu1 %v4754_v41  ;;  %v2241_v23 = vmul.f32 %v6328_v37, %v7230_v48  ;;  %v5179_v32 = vpack.i.bf16 %v2244_v17, %v2243_v4  ;;  %v7233_v41 = vld [vmem:[#allocation25_spill] sm:$0xff]  ;;  %v2210_v17 = vmul.f32 %v6354_v39, %v7237_v36 }
 0x7d8   : > { %4757 = vmatpush1.bf16.msra.mxu1 %v4756_v10  ;;  %v7231_v10 = vld [vmem:[#allocation26_spill] sm:$0xff]  ;;  %v2252_v44 = vmul.f32 %v6331_v9, %v7233_v41  ;;  %v7241_v36 = vld [vmem:[#allocation17_spill] sm:$0xff] }
 0x7d9   : > { %v5174_v27 = vpack.i.bf16 %v2242_v55, %v2241_v23  ;;  %v2253_v26 = vmul.f32 %v6334_v62, %v7231_v10 }
 0x7da   : > { %5170 = vrot.lane.b32.xlu0 %v5169_v59, %s7229_s22  ;;  %v7235_v59 = vld [vmem:[#allocation23_spill] sm:$0xff] }
 0x7db   : > { %5165 = vrot.lane.b32.xlu1 %v5164_v38, %s7229_s22  ;;  %v2251_v3 = vmul.f32 %v6328_v37, %v7235_v59  ;;  %v5189_v63 = vpack.i.bf16 %v2254_v22, %v2253_v26  ;;  %v7236_v38 = vld [vmem:[#allocation2_spill] sm:$0xff]  ;;  %v5199_v22 = vpack.i.bf16 %v2215_v2, %v2210_v17  ;;  %v6457_v17 = vsel %vm613_vm1, %v6379_v56, 0.0 }
 0x7dc   : > { %v2205_v55 = vmul.f32 %v6357_v21, %v7236_v38  ;;  %v2200_v4 = vmul.f32 %v6354_v39, %v7236_v38  ;;  %v2209_v56 = vmul.f32 %v6457_v17, %v5542_v54 }
 0x7dd   : > { %v5184_v23 = vpack.i.bf16 %v2252_v44, %v2251_v3  ;;  %v2235_v3 = vmul.f32 %v6357_v21, %v7240_v15  ;;  %v2230_v44 = vmul.f32 %v6354_v39, %v7240_v15 }
 0x7de   : > { %5175 = vrot.lane.b32.xlu0 %v5174_v27, %s7234_s21  ;;  %v5194_v27 = vpack.i.bf16 %v2205_v55, %v2200_v4  ;;  %v2245_v55 = vmul.f32 %v6357_v21, %v7241_v36  ;;  %v7242_v4 = vld [vmem:[#allocation22_spill] sm:$0xff] }
 0x7df   : > { %5180 = vrot.lane.b32.xlu1 %v5179_v32, %s7234_s21  ;;  %v7239_v32 = vld [vmem:[#allocation7_spill] sm:$0xff]  ;;  %v2255_v2 = vmul.f32 %v6357_v21, %v7242_v4  ;;  %v2250_v15 = vmul.f32 %v6354_v39, %v7242_v4 }
 0x7e0   : > { %v2225_v26 = vmul.f32 %v6357_v21, %v7239_v32 }
 0x7e2   : > { %5190 = vrot.lane.b32.xlu0 %v5189_v63, %s7238_s30  ;;  %v2220_v63 = vmul.f32 %v6354_v39, %v7239_v32 }
 0x7e3   : > { %5185 = vrot.lane.b32.xlu1 %v5184_v23, %s7238_s30  ;;  %v5209_v23 = vpack.i.bf16 %v2235_v3, %v2230_v44  ;;  %v2208_v3 = vmul.f32 %v6387_v35, %v5550_v58  ;;  %v2217_v58 = vmul.f32 %v6377_v53, %v7209_v33  ;;  %v2226_v33 = vmul.f32 %v6360_v40, %v7218_v5 }
 0x7e4   : > { %v5204_v38 = vpack.i.bf16 %v2225_v26, %v2220_v63  ;;  %v2207_v26 = vmul.f32 %v6377_v53, %v5547_v57  ;;  %v2206_v63 = vmul.f32 %v6360_v40, %v5531_v50  ;;  %v2219_v57 = vmul.f32 %v6457_v17, %v7208_v12 }
 0x7e5   : > { %v2216_v50 = vmul.f32 %v6360_v40, %v7211_v1  ;;  %v2229_v12 = vmul.f32 %v6457_v17, %v7216_v52  ;;  %v7243_v1 = vld [vmem:[#allocation28_spill] sm:$0xff]  ;;  %v7246_v52 = vld [vmem:[#allocation29_spill] sm:$0xff] }
 0x7e6   : > { %5195 = vrot.lane.b32.xlu0 %v5194_v27, %s7210_s24  ;;  %v2240_v27 = vmul.f32 %v6354_v39, %v7241_v36  ;;  %v5224_v44 = vpack.i.bf16 %v2207_v26, %v2206_v63  ;;  %v5229_v36 = vpack.i.bf16 %v2209_v56, %v2208_v3  ;;  %v2261_v26 = vmul.f32 %v6328_v37, %v7246_v52 }
 0x7e7   : > { %5200 = vrot.lane.b32.xlu1 %v5199_v22, %s7217_s27  ;;  %v5219_v22 = vpack.i.bf16 %v2255_v2, %v2250_v15  ;;  %v2262_v2 = vmul.f32 %v6331_v9, %v7243_v1  ;;  %v2239_v9 = vmul.f32 %v6457_v17, %v7222_v29  ;;  %v2236_v37 = vmul.f32 %v6360_v40, %v7225_v49 }
 0x7e8   : > { %v5214_v32 = vpack.i.bf16 %v2245_v55, %v2240_v27  ;;  %v2227_v55 = vmul.f32 %v6377_v53, %v7214_v0  ;;  %v7244_v0 = vld [vmem:[#allocation31_spill] sm:$0xff]  ;;  %v2247_v56 = vmul.f32 %v6377_v53, %v7226_v46  ;;  %v2249_v29 = vmul.f32 %v6457_v17, %v7228_v42 }
 0x7e9   : > { %v2263_v15 = vmul.f32 %v6334_v62, %v7244_v0  ;;  %v5249_v5 = vpack.i.bf16 %v2262_v2, %v2261_v26  ;;  %v2237_v62 = vmul.f32 %v6377_v53, %v7223_v31  ;;  %v2246_v31 = vmul.f32 %v6360_v40, %v7230_v48 }
 0x7ea   : > { %5205 = vrot.lane.b32.xlu0 %v5204_v38, %s7224_s28  ;;  %v2218_v38 = vmul.f32 %v6387_v35, %v5582_v19  ;;  %v2228_v19 = vmul.f32 %v6387_v35, %v7215_v24  ;;  %v5244_v4 = vpack.i.bf16 %v2227_v55, %v2226_v33  ;;  %v2258_v49 = vmul.f32 %v6387_v35, %v7231_v10  ;;  %v3354_v55 = vld [vmem:[%s6982_s13] sm:$0xff] }
 0x7eb   : > { %5210 = vrot.lane.b32.xlu1 %v5209_v23, %s7229_s22  ;;  %v5234_v23 = vpack.i.bf16 %v2217_v58, %v2216_v50  ;;  %v5264_v63 = vpack.i.bf16 %v2237_v62, %v2236_v37  ;;  %v2259_v46 = vmul.f32 %v6457_v17, %v7232_v34  ;;  %v2256_v42 = vmul.f32 %v6360_v40, %v7235_v59  ;;  %v2593_v59 = vld [vmem:[%s6972_s3 + $0x8] sm:$0xff] }
 0x7ec   : > { %v5239_v54 = vpack.i.bf16 %v2219_v57, %v2218_v38  ;;  %v5254_v27 = vpack.i.bf16 %v2229_v12, %v2228_v19  ;;  %v2267_v57 = vmul.f32 %v6377_v53, %v7243_v1  ;;  %v2268_v10 = vmul.f32 %v6387_v35, %v7244_v0  ;;  %4068 = vmatprep.mubr.msk.f32.mxu0 %vm756_vm3, %v2593_v59  ;;  %v7248_v58 = vld [vmem:[#allocation27_spill] sm:$0xff] }
 0x7ed   : > { %v5289_v48 = vpack.i.bf16 %v2259_v46, %v2258_v49  ;;  %4069 = vmatprep.mubr.msk.f32.mxu1 %vm756_vm3, %v2593_v59 }
 0x7ee   : > { %5215 = vrot.lane.b32.xlu0 %v5214_v32, %s7234_s21  ;;  %v7245_v32 = vld [vmem:[#allocation30_spill] sm:$0xff] }
 0x7ef   : > { %5220 = vrot.lane.b32.xlu1 %v5219_v22, %s7238_s30  ;;  %v2264_v24 = vmul.f32 %v6337_v18, %v7245_v32  ;;  %v2238_v22 = vmul.f32 %v6387_v35, %v7221_v45  ;;  %v2248_v45 = vmul.f32 %v6387_v35, %v7227_v61  ;;  %v2257_v61 = vmul.f32 %v6377_v53, %v7233_v41 }
 0x7f0   : > { %v2269_v34 = vmul.f32 %v6457_v17, %v7245_v32  ;;  %v2266_v41 = vmul.f32 %v6360_v40, %v7246_v52  ;;  %v2265_v35 = vmul.f32 %v6357_v21, %v7248_v58  ;;  %v2260_v40 = vmul.f32 %v6354_v39, %v7248_v58  ;;  %v2744_v21 = vld [vmem:[%s6981_s12] sm:$0xff] }
 0x7f1   : > { %v5259_v3 = vpack.i.bf16 %v2264_v24, %v2263_v15  ;;  %v5269_v18 = vpack.i.bf16 %v2239_v9, %v2238_v22  ;;  %v5279_v38 = vpack.i.bf16 %v2249_v29, %v2248_v45  ;;  %v3355_v39 = vld [vmem:[%s6983_s14] sm:$0xff] }
 0x7f2   : > { %5225 = vrot.lane.b32.xlu0 %v5224_v44, %s7210_s24  ;;  %v5274_v44 = vpack.i.bf16 %v2247_v56, %v2246_v31  ;;  %v5294_v53 = vpack.i.bf16 %v2267_v57, %v2266_v41  ;;  %v5299_v17 = vpack.i.bf16 %v2269_v34, %v2268_v10  ;;  %v5304_v50 = vpack.i.bf16 %v2265_v35, %v2260_v40 }
 0x7f3   : > { %5230 = vrot.lane.b32.xlu1 %v5229_v36, %s7210_s24  ;;  %v5284_v36 = vpack.i.bf16 %v2257_v61, %v2256_v42 }
 0x7f6   : > { %5240 = vrot.lane.b32.xlu0 %v5239_v54, %s7217_s27  ;;  %v2743_v54 = vld [vmem:[%s6980_s11] sm:$0xff] }
 0x7f7   : > { %5235 = vrot.lane.b32.xlu1 %v5234_v23, %s7217_s27 }
 0x7fa   : > { %5245 = vrot.lane.b32.xlu0 %v5244_v4, %s7224_s28 }
 0x7fb   : > { %5255 = vrot.lane.b32.xlu1 %v5254_v27, %s7224_s28 }
 0x7fe   : > { %5250 = vrot.lane.b32.xlu0 %v5249_v5, %s7247_s16 }
 0x7ff   : > { %5260 = vrot.lane.b32.xlu1 %v5259_v3, %s7247_s16 }
 0x802   : > { %5270 = vrot.lane.b32.xlu0 %v5269_v18, %s7229_s22 }
 0x803   : > { %5265 = vrot.lane.b32.xlu1 %v5264_v63, %s7229_s22 }
 0x806   : > { %5275 = vrot.lane.b32.xlu0 %v5274_v44, %s7234_s21 }
 0x807   : > { %5280 = vrot.lane.b32.xlu1 %v5279_v38, %s7234_s21 }
 0x80a   : > { %5290 = vrot.lane.b32.xlu0 %v5289_v48, %s7238_s30 }
 0x80b   : > { %5285 = vrot.lane.b32.xlu1 %v5284_v36, %s7238_s30 }
 0x80e   : > { %5295 = vrot.lane.b32.xlu0 %v5294_v53, %s7247_s16 }
 0x80f   : > { %5300 = vrot.lane.b32.xlu1 %v5299_v17, %s7247_s16 }
 0x812   : > { %5305 = vrot.lane.b32.xlu0 %v5304_v50, %s7247_s16 }
 0x813   : > { %3184 = vperm.xlu1 %5132, %v2743_v54  }
 0x816   : > { %3339 = vperm.xlu0 %5133, %v2744_v21  }
 0x817   : > { %3795 = vperm.xlu1 %5132, %v3354_v55  }
 0x81a   : > { %3950 = vperm.xlu0 %5133, %v3355_v39  }
 0x840   : > { %v5136_v23 = vpop.permute.xlu0 %5135 }
 0x841   : > { %v5141_v19 = vpop.permute.xlu1 %5140  ;;  %v5138_v9 = vunpack.i.h.bf16 %v5136_v23  ;;  %v5137_v3 = vunpack.i.l.bf16 %v5136_v23 }
 0x842   : > { %v5143_v62 = vunpack.i.h.bf16 %v5141_v19  ;;  %v5142_v37 = vunpack.i.l.bf16 %v5141_v19 }
 0x843   : > { %v2301_v42 = vsel %vm953_vm8, %v5137_v3, %v5138_v9 }
 0x844   : > { %v5151_v12 = vpop.permute.xlu0 %5150  ;;  %v2302_v61 = vsel %vm953_vm8, %v5138_v9, %v5142_v37  ;;  %v2303_v36 = vsel %vm953_vm8, %v5142_v37, %v5143_v62 }
 0x845   : > { %v6569_v33 = vpop.permute.xlu1 %5145  ;;  %v5153_v18 = vunpack.i.h.bf16 %v5151_v12  ;;  %v5152_v56 = vunpack.i.l.bf16 %v5151_v12 }
 0x846   : > { %v5148_v63 = vunpack.i.h.bf16 %v6569_v33  ;;  %v5147_v45 = vunpack.i.l.bf16 %v6569_v33 }
 0x847   : > { %v2349_v10 = vsel %vm977_vm9, %v5152_v56, %v5153_v18 }
 0x848   : > { %v6571_v4 = vpop.permute.xlu0 %5155  ;;  %v6602_v48 = vsel %vm977_vm9, %v5148_v63, %v5152_v56  ;;  %v2347_v59 = vsel %vm977_vm9, %v5147_v45, %v5148_v63 }
 0x849   : > { %v5161_v1 = vpop.permute.xlu1 %5160  ;;  %v5158_v29 = vunpack.i.h.bf16 %v6571_v4  ;;  %v5157_v31 = vunpack.i.l.bf16 %v6571_v4 }
 0x84a   : > { %v5163_v44 = vunpack.i.h.bf16 %v5161_v1  ;;  %v5162_v49 = vunpack.i.l.bf16 %v5161_v1 }
 0x84b   : > { %v6613_v53 = vsel %vm1001_vm10, %v5157_v31, %v5158_v29 }
 0x84c   : > { %v6573_v2 = vpop.permute.xlu0 %5170  ;;  %v6607_v34 = vsel %vm1001_vm10, %v5158_v29, %v5162_v49  ;;  %v6616_v58 = vsel %vm1001_vm10, %v5162_v49, %v5163_v44 }
 0x84d   : > { %v6575_v27 = vpop.permute.xlu1 %5165  ;;  %v5173_v35 = vunpack.i.h.bf16 %v6573_v2  ;;  %v5172_v21 = vunpack.i.l.bf16 %v6573_v2 }
 0x84e   : > { %v5168_v55 = vunpack.i.h.bf16 %v6575_v27 }
 0x84f   : > { %v2441_v4 = vsel %vm1025_vm11, %v5172_v21, %v5173_v35 }
 0x850   : > { %v6577_v0 = vpop.permute.xlu0 %5175 }
 0x851   : > { %v6579_v15 = vpop.permute.xlu1 %5180 }
 0x854   : > { %v6581_v32 = vpop.permute.xlu0 %5190 }
 0x855   : > { %v6583_v24 = vpop.permute.xlu1 %5185 }
 0x858   : > { %v5196_v52 = vpop.permute.xlu0 %5195 }
 0x859   : > { %v6585_v26 = vpop.permute.xlu1 %5200  ;;  %v5197_v57 = vunpack.i.l.bf16 %v5196_v52  ;;  %v5198_v17 = vunpack.i.h.bf16 %v5196_v52 }
 0x85a   : > { %v5202_v12 = vunpack.i.l.bf16 %v6585_v26 }
 0x85b   : > { %v2300_v19 = vsel %vm953_vm8, %v5197_v57, %v5137_v3  ;;  %v5167_v3 = vunpack.i.l.bf16 %v6575_v27  ;;  %v5203_v57 = vunpack.i.h.bf16 %v6585_v26 }
 0x85c   : > { %v6587_v5 = vpop.permute.xlu0 %5205 }
 0x85d   : > { %v6589_v22 = vpop.permute.xlu1 %5210 }
 0x860   : > { %v6595_v46 = vpop.permute.xlu0 %5215 }
 0x861   : > { %v6597_v38 = vpop.permute.xlu1 %5220 }
 0x864   : > { %v5226_v41 = vpop.permute.xlu0 %5225 }
 0x865   : > { %v5228_v40 = vunpack.i.h.bf16 %v5226_v41  ;;  %v5227_v50 = vunpack.i.l.bf16 %v5226_v41  ;;  %v5231_v54 = vpop.permute.xlu1 %5230 }
 0x866   : > { %v5233_v39 = vunpack.i.h.bf16 %v5231_v54  ;;  %v5232_v23 = vunpack.i.l.bf16 %v5231_v54 }
 0x867   : > { %v2304_v33 = vsel %vm953_vm8, %v5198_v17, %v5227_v50  ;;  %v2305_v1 = vsel %vm953_vm8, %v5227_v50, %v5228_v40  ;;  %v5178_v50 = vunpack.i.h.bf16 %v6577_v0 }
 0x868   : > { %v4724_v9 = vpack.c.bf16 %v2304_v33, %v2300_v19  ;;  %v2306_v52 = vsel %vm953_vm8, %v5228_v40, %v5232_v23  ;;  %v5241_v62 = vpop.permute.xlu0 %5240  ;;  %v4722_v37 = vpack.c.bf16 %v2305_v1, %v2301_v42  ;;  %v2307_v18 = vsel %vm953_vm8, %v5232_v23, %v5233_v39 }
 0x869   : > { %v4760_v56 = vpack.c.bf16 %v2306_v52, %v2302_v61  ;;  %v5243_v63 = vunpack.i.h.bf16 %v5241_v62  ;;  %v5242_v29 = vunpack.i.l.bf16 %v5241_v62  ;;  %v5236_v44 = vpop.permute.xlu1 %5235  ;;  %v4758_v49 = vpack.c.bf16 %v2307_v18, %v2303_v36 }
 0x86a   : > { %v5238_v41 = vunpack.i.h.bf16 %v5236_v44  ;;  %v5237_v17 = vunpack.i.l.bf16 %v5236_v44  ;;  %4723 = vmatprep.subr.bf16.mxu0 %v4722_v37  ;;  %v2346_v40 = vsel %vm977_vm9, %v5202_v12, %v5147_v45  ;;  %v5208_v42 = vunpack.i.h.bf16 %v6587_v5 }
 0x86b   : > { %4725 = vmatpush1.bf16.msra.mxu0 %v4724_v9  ;;  %4759 = vmatprep.subr.bf16.mxu1 %v4758_v49  ;;  %v2353_v61 = vsel %vm977_vm9, %v5242_v29, %v5243_v63  ;;  %v5207_v9 = vunpack.i.l.bf16 %v6587_v5  ;;  %v5177_v18 = vunpack.i.l.bf16 %v6577_v0  ;;  %v5183_v63 = vunpack.i.h.bf16 %v6579_v15 }
 0x86c   : > { %v2352_v54 = vsel %vm977_vm9, %v5238_v41, %v5242_v29  ;;  %v2350_v36 = vsel %vm977_vm9, %v5203_v57, %v5237_v17  ;;  %v5246_v39 = vpop.permute.xlu0 %5245  ;;  %4761 = vmatpush1.bf16.msra.mxu1 %v4760_v56  ;;  %v4762_v26 = vpack.c.bf16 %v2353_v61, %v2349_v10  ;;  %v2351_v23 = vsel %vm977_vm9, %v5237_v17, %v5238_v41 }
 0x86d   : > { %v4728_v19 = vpack.c.bf16 %v2350_v36, %v2346_v40  ;;  %v4764_v33 = vpack.c.bf16 %v2352_v54, %v6602_v48  ;;  %v5248_v1 = vunpack.i.h.bf16 %v5246_v39  ;;  %v5247_v45 = vunpack.i.l.bf16 %v5246_v39  ;;  %v5256_v12 = vpop.permute.xlu1 %5255 }
 0x86e   : > { %v5258_v52 = vunpack.i.h.bf16 %v5256_v12  ;;  %v5257_v62 = vunpack.i.l.bf16 %v5256_v12  ;;  %4763 = vmatprep.subr.bf16.mxu1 %v4762_v26  ;;  %v4726_v37 = vpack.c.bf16 %v2351_v23, %v2347_v59  ;;  %v5182_v10 = vunpack.i.l.bf16 %v6579_v15 }
 0x86f   : > { %v2397_v56 = vsel %vm1001_vm10, %v5247_v45, %v5248_v1  ;;  %v5193_v29 = vunpack.i.h.bf16 %v6581_v32  ;;  %v2396_v48 = vsel %vm1001_vm10, %v5208_v42, %v5247_v45  ;;  %v5192_v49 = vunpack.i.l.bf16 %v6581_v32 }
 0x870   : > { %v2398_v44 = vsel %vm1001_vm10, %v5248_v1, %v5257_v62  ;;  %4727 = vmatprep.subr.bf16.mxu0 %v4726_v37  ;;  %v6645_v5 = vpop.permute.xlu0 %5250  ;;  %4765 = vmatpush1.bf16.msra.mxu1 %v4764_v33  ;;  %v4730_v59 = vpack.c.bf16 %v2397_v56, %v6613_v53  ;;  %v5188_v57 = vunpack.i.h.bf16 %v6583_v24  ;;  %v2399_v17 = vsel %vm1001_vm10, %v5257_v62, %v5258_v52 }
 0x871   : > { %v4768_v15 = vpack.c.bf16 %v2398_v44, %v6607_v34  ;;  %4729 = vmatpush1.bf16.msra.mxu0 %v4728_v19  ;;  %v6651_v41 = vpop.permute.xlu1 %5260  ;;  %v5187_v40 = vunpack.i.l.bf16 %v6583_v24  ;;  %v2392_v42 = vsel %vm1001_vm10, %v5207_v9, %v5157_v31  ;;  %v4766_v53 = vpack.c.bf16 %v2399_v17, %v6616_v58 }
 0x872   : > { %4731 = vmatprep.subr.bf16.mxu0 %v4730_v59  ;;  %v2440_v32 = vsel %vm1025_vm11, %v5168_v55, %v5172_v21  ;;  %v5212_v34 = vunpack.i.l.bf16 %v6589_v22  ;;  %v4732_v61 = vpack.c.bf16 %v2396_v48, %v2392_v42  ;;  %v6671_v24 = vsel %vm1049_vm12, %v5178_v50, %v5182_v10 }
 0x873   : > { %4767 = vmatprep.subr.bf16.mxu1 %v4766_v53  ;;  %v2439_v58 = vsel %vm1025_vm11, %v5167_v3, %v5168_v55  ;;  %v2485_v54 = vsel %vm1049_vm12, %v5177_v18, %v5178_v50  ;;  %v2487_v36 = vsel %vm1049_vm12, %v5182_v10, %v5183_v63  ;;  %v6683_v2 = vsel %vm1073_vm13, %v5188_v57, %v5192_v49 }
 0x874   : > { %v5271_v31 = vpop.permute.xlu0 %5270  ;;  %4769 = vmatpush1.bf16.msra.mxu1 %v4768_v15  ;;  %v6686_v26 = vsel %vm1073_vm13, %v5192_v49, %v5193_v29  ;;  %v5213_v23 = vunpack.i.h.bf16 %v6589_v22  ;;  %v7249_v50 = vpack.c.bf16 %v6305_v20, %v6284_v30  ;;  %v7250_v33 = vpack.c.bf16 %v6303_v47, %v6301_v13 }
 0x875   : > { %v5273_v35 = vunpack.i.h.bf16 %v5271_v31  ;;  %v5272_v21 = vunpack.i.l.bf16 %v5271_v31  ;;  %4733 = vmatpush1.bf16.msra.mxu0 %v4732_v61  ;;  %v5266_v39 = vpop.permute.xlu1 %5265  ;;  %v6696_v1 = vsel %vm1073_vm13, %v5187_v40, %v5188_v57  ;;  %v2438_v45 = vsel %vm1025_vm11, %v5212_v34, %v5167_v3 }
 0x876   : > { %v5268_v55 = vunpack.i.h.bf16 %v5266_v39  ;;  %v5267_v19 = vunpack.i.l.bf16 %v5266_v39  ;;  %4735 = vmatprep.subr.bf16.mxu0 %v7249_v50  ;;  %4771 = vmatprep.subr.bf16.mxu1 %v7250_v33  ;;  %v5217_v12 = vunpack.i.l.bf16 %v6595_v46  ;;  %v5222_v22 = vunpack.i.l.bf16 %v6597_v38 }
 0x877   : > { %v2445_v9 = vsel %vm1025_vm11, %v5272_v21, %v5273_v35  ;;  %v7251_v3 = vpack.c.bf16 %v6297_v14, %v6281_v43  ;;  %v7252_v10 = vpack.c.bf16 %v6299_v28, %v6295_v60  ;;  %v5218_v29 = vunpack.i.h.bf16 %v6595_v46 }
 0x878   : > { %v2444_v30 = vsel %vm1025_vm11, %v5268_v55, %v5272_v21  ;;  %v2442_v20 = vsel %vm1025_vm11, %v5213_v23, %v5267_v19  ;;  %v5276_v52 = vpop.permute.xlu0 %5275  ;;  %v4774_v13 = vpack.c.bf16 %v2445_v9, %v2441_v4  ;;  %v2443_v47 = vsel %vm1025_vm11, %v5267_v19, %v5268_v55 }
 0x879   : > { %v4740_v62 = vpack.c.bf16 %v2442_v20, %v2438_v45  ;;  %v4776_v37 = vpack.c.bf16 %v2444_v30, %v2440_v32  ;;  %v5278_v63 = vunpack.i.h.bf16 %v5276_v52  ;;  %v5277_v27 = vunpack.i.l.bf16 %v5276_v52  ;;  %4737 = vmatpush1.bf16.msra.mxu0 %v7251_v3  ;;  %4773 = vmatpush1.bf16.msra.mxu1 %v7252_v10  ;;  %v5281_v56 = vpop.permute.xlu1 %5280  ;;  %v2592_v3 = vld [vmem:[%s6972_s3] sm:$0xff]  ;;  %v7253_v10 = vld [vmem:[#allocation37_spill] sm:$0xff] }
 0x87a   : > { %v5283_v48 = vunpack.i.h.bf16 %v5281_v56  ;;  %v5282_v44 = vunpack.i.l.bf16 %v5281_v56  ;;  %4775 = vmatprep.subr.bf16.mxu1 %v4774_v13  ;;  %v4738_v59 = vpack.c.bf16 %v2443_v47, %v2439_v58  ;;  %v2484_v49 = vsel %vm1049_vm12, %v5217_v12, %v5177_v18  ;;  %v7254_v56 = vld [vmem:[#allocation36_spill] sm:$0xff] }
 0x87b   : > { %v5223_v57 = vunpack.i.h.bf16 %v6597_v38  ;;  %v2530_v43 = vsel %vm1073_vm13, %v5222_v22, %v5187_v40  ;;  %v2489_v14 = vsel %vm1049_vm12, %v5277_v27, %v5278_v63  ;;  %v2488_v60 = vsel %vm1049_vm12, %v5218_v29, %v5277_v27  ;;  %v7255_v29 = vld [vmem:[#allocation39_spill] sm:$0xff] }
 0x87c   : > { %v2490_v28 = vsel %vm1049_vm12, %v5278_v63, %v5282_v44  ;;  %4739 = vmatprep.subr.bf16.mxu0 %v4738_v59  ;;  %v5291_v46 = vpop.permute.xlu0 %5290  ;;  %v4742_v15 = vpack.c.bf16 %v2489_v14, %v2485_v54  ;;  %v2491_v17 = vsel %vm1049_vm12, %v5282_v44, %v5283_v48  ;;  %v5253_v40 = vunpack.i.h.bf16 %v6645_v5  ;;  %v7256_v48 = vld [vmem:[#allocation38_spill] sm:$0xff]  ;;  %v7257_v44 = vld [vmem:[#allocation41_spill] sm:$0xff]  ;;  %v7258_v59 = vld [vmem:[#allocation40_spill] sm:$0xff] }
 0x87d   : > { %v4780_v42 = vpack.c.bf16 %v2490_v28, %v6671_v24  ;;  %v5293_v0 = vunpack.i.h.bf16 %v5291_v46  ;;  %v5292_v53 = vunpack.i.l.bf16 %v5291_v46  ;;  %4741 = vmatpush1.bf16.msra.mxu0 %v4740_v62  ;;  %4777 = vmatpush1.bf16.msra.mxu1 %v4776_v37  ;;  %v5286_v38 = vpop.permute.xlu1 %5285  ;;  %v4778_v18 = vpack.c.bf16 %v2491_v17, %v2487_v36  ;;  %v7262_v14 = vld [vmem:[#allocation44_spill] sm:$0xff]  ;;  %v7264_v28 = vld [vmem:[#allocation46_spill] sm:$0xff]  ;;  %v7265_v46 = vld [vmem:[#allocation49_spill] sm:$0xff] }
 0x87e   : > { %v5252_v32 = vunpack.i.l.bf16 %v6645_v5  ;;  %v5288_v34 = vunpack.i.h.bf16 %v5286_v38  ;;  %v5287_v61 = vunpack.i.l.bf16 %v5286_v38  ;;  %4743 = vmatprep.subr.bf16.mxu0 %v4742_v15  ;;  %v5263_v4 = vunpack.i.h.bf16 %v6651_v41  ;;  %v7266_v15 = vld [vmem:[#allocation48_spill] sm:$0xff]  ;;  %v7267_v17 = vld [vmem:[#allocation51_spill] sm:$0xff] }
 0x87f   : > { %v5262_v31 = vunpack.i.l.bf16 %v6651_v41  ;;  %v4744_v58 = vpack.c.bf16 %v2488_v60, %v2484_v49  ;;  %4779 = vmatprep.subr.bf16.mxu1 %v4778_v18  ;;  %v2537_v24 = vsel %vm1073_vm13, %v5292_v53, %v5293_v0  ;;  %v7259_v49 = vld [vmem:[#allocation43_spill] sm:$0xff]  ;;  %v7269_v0 = vld [vmem:[#allocation53_spill] sm:$0xff]  ;;  %v7272_v18 = vld [vmem:[#allocation54_spill] sm:$0xff] }
 0x880   : > { %v2536_v54 = vsel %vm1073_vm13, %v5288_v34, %v5292_v53  ;;  %v2534_v35 = vsel %vm1073_vm13, %v5223_v57, %v5287_v61  ;;  %v5296_v36 = vpop.permute.xlu0 %5295  ;;  %v4782_v21 = vpack.c.bf16 %v2537_v24, %v6686_v26  ;;  %v2535_v5 = vsel %vm1073_vm13, %v5287_v61, %v5288_v34  ;;  %v7260_v57 = vld [vmem:[#allocation42_spill] sm:$0xff]  ;;  %v7263_v60 = vld [vmem:[#allocation47_spill] sm:$0xff]  ;;  %v7270_v53 = vld [vmem:[#allocation52_spill] sm:$0xff] }
 0x881   : > { %v4748_v39 = vpack.c.bf16 %v2534_v35, %v2530_v43  ;;  %v4784_v23 = vpack.c.bf16 %v2536_v54, %v6683_v2  ;;  %v5298_v55 = vunpack.i.h.bf16 %v5296_v36  ;;  %v5297_v19 = vunpack.i.l.bf16 %v5296_v36  ;;  %4745 = vmatpush1.bf16.msra.mxu0 %v4744_v58  ;;  %4781 = vmatpush1.bf16.msra.mxu1 %v4780_v42  ;;  %v5301_v41 = vpop.permute.xlu1 %5300  ;;  %v7261_v43 = vld [vmem:[#allocation45_spill] sm:$0xff]  ;;  %v7268_v42 = vld [vmem:[#allocation50_spill] sm:$0xff]  ;;  %v7271_v38 = vld [vmem:[#allocation55_spill] sm:$0xff] }
 0x882   : > { %v5303_v50 = vunpack.i.h.bf16 %v5301_v41  ;;  %v5302_v33 = vunpack.i.l.bf16 %v5301_v41  ;;  %4783 = vmatprep.subr.bf16.mxu1 %v4782_v21  ;;  %v4746_v45 = vpack.c.bf16 %v2535_v5, %v6696_v1  ;;  %v2578_v12 = vsel %vm1097_vm14, %v5253_v40, %v5262_v31  ;;  %v7275_v34 = vld [vmem:[#allocation59_spill] sm:$0xff]  ;;  %v7276_v61 = vld [vmem:[#allocation58_spill] sm:$0xff]  ;;  %v526_v24 = vld [vmem:[%s512_s29 + $0x10] sm:$0xff] }
 0x883   : > { %v2577_v22 = vsel %vm1097_vm14, %v5252_v32, %v5253_v40  ;;  %v2581_v26 = vsel %vm1097_vm14, %v5297_v19, %v5298_v55  ;;  %v2579_v20 = vsel %vm1097_vm14, %v5262_v31, %v5263_v4  ;;  %v7273_v40 = vld [vmem:[#allocation56_spill] sm:$0xff]  ;;  %v7279_v58 = vld [vmem:[#allocation63_spill] sm:$0xff]  ;;  %v527_v54 = vld [vmem:[%s512_s29 + $0x18] sm:$0xff] }
 0x884   : > { %v2582_v9 = vsel %vm1097_vm14, %v5298_v55, %v5302_v33  ;;  %4747 = vmatprep.subr.bf16.mxu0 %v4746_v45  ;;  %v5306_v2 = vpop.permute.xlu0 %5305  ;;  %v4750_v30 = vpack.c.bf16 %v2581_v26, %v2577_v22  ;;  %v2583_v52 = vsel %vm1097_vm14, %v5302_v33, %v5303_v50  ;;  %v7277_v4 = vld [vmem:[#allocation60_spill] sm:$0xff]  ;;  %v525_v36 = vld [vmem:[%s512_s29 + $0x8] sm:$0xff]  ;;  %v524_v21 = vld [vmem:[%s512_s29] sm:$0xff] }
 0x885   : > { %v4788_v13 = vpack.c.bf16 %v2582_v9, %v2578_v12  ;;  %v5308_v47 = vunpack.i.h.bf16 %v5306_v2  ;;  %v5307_v62 = vunpack.i.l.bf16 %v5306_v2  ;;  %4749 = vmatpush1.bf16.msra.mxu0 %v4748_v39  ;;  %4785 = vmatpush1.bf16.msra.mxu1 %v4784_v23  ;;  %v4786_v1 = vpack.c.bf16 %v2583_v52, %v2579_v20  ;;  %v7278_v31 = vld [vmem:[#allocation64_spill] sm:$0xff]  ;;  %v7280_v33 = vld [vmem:[#allocation62_spill] sm:$0xff]  ;;  %v7281_v45 = vld [vmem:[#allocation61_spill] sm:$0xff] }
 0x886   : > { %4751 = vmatprep.subr.bf16.mxu0 %v4750_v30  ;;  %v7282_v12 = vmov 0.0  }
 0x887   : > { %v2576_v37 = vsel %vm1097_vm14, %v5307_v62, %v5252_v32  ;;  %v2580_v63 = vsel %vm1097_vm14, %v5308_v47, %v5297_v19  ;;  %4787 = vmatprep.subr.bf16.mxu1 %v4786_v1  ;;  %v7274_v32 = vld [vmem:[#allocation57_spill] sm:$0xff] }
 0x888   : > { %v4752_v27 = vpack.c.bf16 %v2580_v63, %v2576_v37 }
 0x889   : > { %4789 = vmatpush1.bf16.msra.mxu1 %v4788_v13 }
 0x88a   : > { %4753 = vmatpush1.bf16.msra.mxu0 %v4752_v27  ;;  %4823 = vmatprep.subr.bf16.mxu1 %v5796_v16 }
 0x88b   : > { %4791 = vmatprep.subr.bf16.mxu0 %v5828_v8 }
 0x88c   : > { %2733 = vmatmul.mubr.f32.vlgmr.msra.gmra.mrb[22].mxu1 %v2592_v3 }
 0x88d   : > { %2662 = vmatmul.mubr.f32.vlgmr.msra.gmra.mrb[22].mxu0 %v2592_v3  ;;  %4825 = vmatpush3.bf16.msra.mxu1 %v5809_v11 }
 0x88e   : > { %4793 = vmatpush3.bf16.msra.mxu0 %v5847_v51  ;;  %4827 = vmatprep.subr.bf16.mxu1 %v5817_v25 }
 0x88f   : > { %4795 = vmatprep.subr.bf16.mxu0 %v5858_v6 }
 0x891   : > { %4829 = vmatpush3.bf16.msra.mxu1 %v5849_v7 }
 0x892   : > { %4797 = vmatpush3.bf16.msra.mxu0 %v7253_v10  ;;  %4831 = vmatprep.subr.bf16.mxu1 %v7254_v56 }
 0x893   : > { %4799 = vmatprep.subr.bf16.mxu0 %v7255_v29 }
 0x895   : > { %4833 = vmatpush3.bf16.msra.mxu1 %v7256_v48 }
 0x896   : > { %4801 = vmatpush3.bf16.msra.mxu0 %v7257_v44  ;;  %4835 = vmatprep.subr.bf16.mxu1 %v7258_v59 }
 0x897   : > { %4803 = vmatprep.subr.bf16.mxu0 %v7259_v49 }
 0x899   : > { %4837 = vmatpush3.bf16.msra.mxu1 %v7260_v57 }
 0x89a   : > { %4805 = vmatpush3.bf16.msra.mxu0 %v7261_v43  ;;  %4839 = vmatprep.subr.bf16.mxu1 %v7262_v14 }
 0x89b   : > { %4807 = vmatprep.subr.bf16.mxu0 %v7263_v60 }
 0x89d   : > { %4841 = vmatpush3.bf16.msra.mxu1 %v7264_v28 }
 0x89e   : > { %4809 = vmatpush3.bf16.msra.mxu0 %v7265_v46  ;;  %4843 = vmatprep.subr.bf16.mxu1 %v7266_v15 }
 0x89f   : > { %4811 = vmatprep.subr.bf16.mxu0 %v7267_v17 }
 0x8a1   : > { %4845 = vmatpush3.bf16.msra.mxu1 %v7268_v42 }
 0x8a2   : > { %4813 = vmatpush3.bf16.msra.mxu0 %v7269_v0  ;;  %4847 = vmatprep.subr.bf16.mxu1 %v7270_v53 }
 0x8a3   : > { %4815 = vmatprep.subr.bf16.mxu0 %v7271_v38 }
 0x8a5   : > { %4849 = vmatpush3.bf16.msra.mxu1 %v7272_v18 }
 0x8a6   : > { %4817 = vmatpush3.bf16.msra.mxu0 %v7273_v40  ;;  %4851 = vmatprep.subr.bf16.mxu1 %v7274_v32 }
 0x8a7   : > { %4819 = vmatprep.subr.bf16.mxu0 %v7275_v34 }
 0x8a9   : > { %4853 = vmatpush3.bf16.msra.mxu1 %v7276_v61 }
 0x8aa   : > { %4821 = vmatpush3.bf16.msra.mxu0 %v7277_v4  ;;  %4073 = vmatprep.subr.msk.mxu1 %vm1540_vm0, %v7278_v31 }
 0x8ab   : > { %4070 = vmatprep.subr.msk.mxu0 %vm1540_vm0, %v7279_v58 }
 0x95f   : > { %v2734_v35 = vpop.f32.mrb[22].mxu1 }
 0x960   : > { %v2663_v5 = vpop.f32.mrb[22].mxu0  ;;  %v2741_v39 = vadd.f32 %v2734_v35, %v526_v24  ;;  %v2736_v23 = vpop.f32.mrb[23].mxu1 }
 0x961   : > { %v2665_v55 = vpop.f32.mrb[23].mxu0  ;;  %v2742_v19 = vadd.f32 %v2736_v23, %v527_v54  ;;  %v2739_v50 = vadd.f32 %v2663_v5, %v524_v21 }
 0x962   : > { %v2740_v41 = vadd.f32 %v2665_v55, %v525_v36 }
 0x963   : > { %2879 = vmatprep.mubr.f32.mxu1 %v2742_v19 }
 0x964   : > { %2809 = vmatprep.mubr.f32.mxu0 %v2740_v41  ;;  %2880 = vmatmul.mubr.f32.vlgmr.msra.gmra.mrb[24].mxu1 %v2741_v39 }
 0x965   : > { %2810 = vmatmul.mubr.f32.vlgmr.msra.gmra.mrb[24].mxu0 %v2739_v50  ;;  %4074 = vmatpush1.msk.msra.mxu1 %vm1540_vm0, %v7280_v33 }
 0x966   : > { %4071 = vmatpush1.msk.msra.mxu0 %vm1540_vm0, %v7281_v45  ;;  %2953 = vmatprep.mubr.f32.mxu0 %v7282_v12 }
 0x967   : > { %3024 = vmatprep.mubr.f32.mxu1 %v7282_v12  ;;  %4855 = vmatprep.subr.bf16.mxu0 %v5828_v8 }
 0x968   : > { %4887 = vmatprep.subr.bf16.mxu1 %v5796_v16 }
 0xa37   : > { %v4323_v22 = vpop.f32.mrb[24].mxu1 }
 0xa38   : > { %v4288_v26 = vpop.f32.mrb[24].mxu0  ;;  %v4324_v9 = vpop.f32.mrb[25].mxu1 }
 0xa39   : > { %v4289_v2 = vpop.f32.mrb[25].mxu0  ;;  %v4325_v30 = vadd.f32 %v4324_v9, %v4323_v22 }
 0xa3a   : > { %v4290_v20 = vadd.f32 %v4289_v2, %v4288_v26  ;;  %v3185_v2 = vpop.permute.xlu1 %3184 }
 0xa3c   : > { %v2882_v52 = vadd.f32 %v4325_v30, %v4290_v20 }
 0xa3e   : > { %v2885_v13 = vmul.f32 0.00390625, %v2882_v52 }
 0xa40   : > { %4072 = vmatmul.mubr.msk.f32.vlgmr.msra.gmra.mrb[26].mxu0 %vm714_vm2, %v2885_v13  ;;  %4075 = vmatmul.mubr.msk.f32.vlgmr.msra.gmra.mrb[26].mxu1 %vm714_vm2, %v2885_v13 }
 0xa41   : > { %4857 = vmatpush3.bf16.msra.mxu0 %v5847_v51  ;;  %4889 = vmatpush3.bf16.msra.mxu1 %v5809_v11 }
 0xa42   : > { %4859 = vmatprep.subr.bf16.mxu0 %v5858_v6  ;;  %4891 = vmatprep.subr.bf16.mxu1 %v5817_v25 }
 0xa45   : > { %4861 = vmatpush3.bf16.msra.mxu0 %v7253_v10  ;;  %4893 = vmatpush3.bf16.msra.mxu1 %v5849_v7 }
 0xa46   : > { %4863 = vmatprep.subr.bf16.mxu0 %v7255_v29  ;;  %4895 = vmatprep.subr.bf16.mxu1 %v7254_v56 }
 0xa49   : > { %4865 = vmatpush3.bf16.msra.mxu0 %v7257_v44  ;;  %4897 = vmatpush3.bf16.msra.mxu1 %v7256_v48 }
 0xa4a   : > { %4867 = vmatprep.subr.bf16.mxu0 %v7259_v49  ;;  %4899 = vmatprep.subr.bf16.mxu1 %v7258_v59 }
 0xa4d   : > { %4869 = vmatpush3.bf16.msra.mxu0 %v7261_v43  ;;  %4901 = vmatpush3.bf16.msra.mxu1 %v7260_v57 }
 0xa4e   : > { %4871 = vmatprep.subr.bf16.mxu0 %v7263_v60  ;;  %4903 = vmatprep.subr.bf16.mxu1 %v7262_v14 }
 0xa51   : > { %4873 = vmatpush3.bf16.msra.mxu0 %v7265_v46  ;;  %4905 = vmatpush3.bf16.msra.mxu1 %v7264_v28 }
 0xa52   : > { %4875 = vmatprep.subr.bf16.mxu0 %v7267_v17  ;;  %4907 = vmatprep.subr.bf16.mxu1 %v7266_v15 }
 0xa55   : > { %4877 = vmatpush3.bf16.msra.mxu0 %v7269_v0  ;;  %4909 = vmatpush3.bf16.msra.mxu1 %v7268_v42 }
 0xa56   : > { %4879 = vmatprep.subr.bf16.mxu0 %v7271_v38  ;;  %4911 = vmatprep.subr.bf16.mxu1 %v7270_v53 }
 0xa59   : > { %4881 = vmatpush3.bf16.msra.mxu0 %v7273_v40  ;;  %4913 = vmatpush3.bf16.msra.mxu1 %v7272_v18 }
 0xa5a   : > { %4883 = vmatprep.subr.bf16.mxu0 %v7275_v34  ;;  %4915 = vmatprep.subr.bf16.mxu1 %v7274_v32 }
 0xa5d   : > { %4885 = vmatpush3.bf16.msra.mxu0 %v7277_v4  ;;  %4917 = vmatpush3.bf16.msra.mxu1 %v7276_v61 }
 0xa5e   : > { %4076 = vmatprep.subr.msk.mxu0 %vm1540_vm0, %v7279_v58  ;;  %4079 = vmatprep.subr.msk.mxu1 %vm1540_vm0, %v7278_v31 }
 0xb13   : > { %v2955_v47 = vpop.f32.mrb[26].mxu0  ;;  %v3026_v62 = vpop.f32.mrb[26].mxu1 }
 0xb14   : > { %v6830_v1 = vsub.f32 %v2739_v50, %v2955_v47  ;;  %v6832_v37 = vsub.f32 %v2741_v39, %v3026_v62  ;;  %v2957_v63 = vpop.f32.mrb[27].mxu0  ;;  %v3028_v27 = vpop.f32.mrb[27].mxu1 }
 0xb15   : > { %v6834_v3 = vsub.f32 %v2740_v41, %v2957_v63  ;;  %v6836_v24 = vsub.f32 %v2742_v19, %v3028_v27  ;;  %v3340_v27 = vpop.permute.xlu0 %3339 }
 0xb16   : > { %v3035_v36 = vmul.f32 %v6830_v1, %v6830_v1  ;;  %v3037_v21 = vmul.f32 %v6832_v37, %v6832_v37 }
 0xb17   : > { %v3036_v54 = vmul.f32 %v6834_v3, %v6834_v3  ;;  %v3038_v35 = vmul.f32 %v6836_v24, %v6836_v24 }
 0xb19   : > { %3103 = vmatprep.mubr.f32.mxu0 %v3036_v54  ;;  %3173 = vmatprep.mubr.f32.mxu1 %v3038_v35 }
 0xb1a   : > { %3104 = vmatmul.mubr.f32.vlgmr.msra.gmra.mrb[28].mxu0 %v3035_v36  ;;  %3174 = vmatmul.mubr.f32.vlgmr.msra.gmra.mrb[28].mxu1 %v3037_v21 }
 0xb1b   : > { %4077 = vmatpush1.msk.msra.mxu0 %vm1540_vm0, %v7281_v45  ;;  %3255 = vmatprep.mubr.f32.mxu0 %v7282_v12 }
 0xb1c   : > { %4080 = vmatpush1.msk.msra.mxu1 %vm1540_vm0, %v7280_v33  ;;  %3326 = vmatprep.mubr.f32.mxu1 %v7282_v12 }
 0xb1d   : > { %4919 = vmatprep.subr.bf16.mxu0 %v5828_v8  ;;  %4951 = vmatprep.subr.bf16.mxu1 %v5796_v16 }
 0xbed   : > { %v4358_v5 = vpop.f32.mrb[28].mxu0  ;;  %v4393_v39 = vpop.f32.mrb[28].mxu1 }
 0xbee   : > { %v4359_v23 = vpop.f32.mrb[29].mxu0  ;;  %v4394_v55 = vpop.f32.mrb[29].mxu1 }
 0xbef   : > { %v4360_v19 = vadd.f32 %v4359_v23, %v4358_v5  ;;  %v4395_v41 = vadd.f32 %v4394_v55, %v4393_v39  ;;  %v5318_v23 = vld [vmem:[%s5444_s23] sm:$0xff] }
 0xbf1   : > { %v3176_v50 = vadd.f32 %v4395_v41, %v4360_v19  ;;  %v5319_v19 = vld [vmem:[%s5444_s23 + $0x10] sm:$0xff] }
 0xbf3   : > { %v3179_v22 = vmul.f32 0.00390625, %v3176_v50  ;;  %v5321_v50 = vld [vmem:[%s5444_s23 + $0x18] sm:$0xff] }
 0xbf5   : > { %v3180_v26 = vadd.f32 1e-05, %v3179_v22 }
 0xbf7   : > { %5314 = vrsqrt.f32 %v3180_v26 }
 0xc01   : > { %v5315_v9 = vpop.eup %5314 }
 0xc02   : > { %v3187_v30 = vmul.f32 %v5315_v9, %v3185_v2 }
 0xc04   : > { %4078 = vmatmul.mubr.msk.f32.vlgmr.msra.gmra.mrb[30].mxu0 %vm714_vm2, %v3187_v30  ;;  %4081 = vmatmul.mubr.msk.f32.vlgmr.msra.gmra.mrb[30].mxu1 %vm714_vm2, %v3187_v30 }
 0xc05   : > { %4921 = vmatpush3.bf16.msra.mxu0 %v5847_v51  ;;  %4953 = vmatpush3.bf16.msra.mxu1 %v5809_v11 }
 0xc06   : > { %4923 = vmatprep.subr.bf16.mxu0 %v5858_v6  ;;  %4955 = vmatprep.subr.bf16.mxu1 %v5817_v25 }
 0xc09   : > { %4925 = vmatpush3.bf16.msra.mxu0 %v7253_v10  ;;  %4957 = vmatpush3.bf16.msra.mxu1 %v5849_v7 }
 0xc0a   : > { %4927 = vmatprep.subr.bf16.mxu0 %v7255_v29  ;;  %4959 = vmatprep.subr.bf16.mxu1 %v7254_v56 }
 0xc0d   : > { %4929 = vmatpush3.bf16.msra.mxu0 %v7257_v44  ;;  %4961 = vmatpush3.bf16.msra.mxu1 %v7256_v48 }
 0xc0e   : > { %4931 = vmatprep.subr.bf16.mxu0 %v7259_v49  ;;  %4963 = vmatprep.subr.bf16.mxu1 %v7258_v59 }
 0xc11   : > { %4933 = vmatpush3.bf16.msra.mxu0 %v7261_v43  ;;  %4965 = vmatpush3.bf16.msra.mxu1 %v7260_v57 }
 0xc12   : > { %4935 = vmatprep.subr.bf16.mxu0 %v7263_v60  ;;  %4967 = vmatprep.subr.bf16.mxu1 %v7262_v14 }
 0xc15   : > { %4937 = vmatpush3.bf16.msra.mxu0 %v7265_v46  ;;  %4969 = vmatpush3.bf16.msra.mxu1 %v7264_v28 }
 0xc16   : > { %4939 = vmatprep.subr.bf16.mxu0 %v7267_v17  ;;  %4971 = vmatprep.subr.bf16.mxu1 %v7266_v15 }
 0xc19   : > { %4941 = vmatpush3.bf16.msra.mxu0 %v7269_v0  ;;  %4973 = vmatpush3.bf16.msra.mxu1 %v7268_v42 }
 0xc1a   : > { %4943 = vmatprep.subr.bf16.mxu0 %v7271_v38  ;;  %4975 = vmatprep.subr.bf16.mxu1 %v7270_v53 }
 0xc1d   : > { %4945 = vmatpush3.bf16.msra.mxu0 %v7273_v40  ;;  %4977 = vmatpush3.bf16.msra.mxu1 %v7272_v18 }
 0xc1e   : > { %4947 = vmatprep.subr.bf16.mxu0 %v7275_v34  ;;  %4979 = vmatprep.subr.bf16.mxu1 %v7274_v32 }
 0xc21   : > { %4949 = vmatpush3.bf16.msra.mxu0 %v7277_v4  ;;  %4981 = vmatpush3.bf16.msra.mxu1 %v7276_v61 }
 0xc22   : > { %4082 = vmatprep.subr.msk.mxu0 %vm1540_vm0, %v7279_v58  ;;  %4085 = vmatprep.subr.msk.mxu1 %vm1540_vm0, %v7278_v31 }
 0xcd7   : > { %v3257_v20 = vpop.f32.mrb[30].mxu0  ;;  %v3328_v52 = vpop.f32.mrb[30].mxu1 }
 0xcd8   : > { %v3333_v13 = vmul.f32 %v3257_v20, %v6830_v1  ;;  %v3335_v47 = vmul.f32 %v3328_v52, %v6832_v37  ;;  %v3259_v62 = vpop.f32.mrb[31].mxu0  ;;  %v3330_v63 = vpop.f32.mrb[31].mxu1  ;;  %v5320_v1 = vld [vmem:[%s5444_s23 + $0x8] sm:$0xff] }
 0xcd9   : > { %v3334_v54 = vmul.f32 %v3259_v62, %v6834_v3  ;;  %v3336_v35 = vmul.f32 %v3330_v63, %v6836_v24 }
 0xcda   : > { %v3342_v36 = vadd.f32 %v3340_v27, %v3333_v13  ;;  %v3344_v21 = vadd.f32 %v3340_v27, %v3335_v47 }
 0xcdb   : > { %v3343_v5 = vadd.f32 %v3340_v27, %v3334_v54  ;;  %v3345_v39 = vadd.f32 %v3340_v27, %v3336_v35 }
 0xcdc   : > { %v6895_v55 = vadd.f32 %v5318_v23, %v3342_v36  ;;  %v6898_v41 = vadd.f32 %v5319_v19, %v3344_v21 }
 0xcdd   : > { %v6901_v37 = vadd.f32 %v5320_v1, %v3343_v5  ;;  %v6904_v22 = vadd.f32 %v5321_v50, %v3345_v39 }
 0xcde   : > { %v3350_v26 = vmax.f32 %v6895_v55, 0.0  ;;  %v3352_v9 = vmax.f32 %v6898_v41, 0.0 }
 0xcdf   : > { %v3351_v3 = vmax.f32 %v6901_v37, 0.0  ;;  %v3353_v24 = vmax.f32 %v6904_v22, 0.0 }
 0xce1   : > { %3420 = vmatprep.mubr.f32.mxu0 %v3351_v3  ;;  %3490 = vmatprep.mubr.f32.mxu1 %v3353_v24 }
 0xce2   : > { %3421 = vmatmul.mubr.f32.vlgmr.msra.gmra.mrb[32].mxu0 %v3350_v26  ;;  %3491 = vmatmul.mubr.f32.vlgmr.msra.gmra.mrb[32].mxu1 %v3352_v9 }
 0xce3   : > { %4083 = vmatpush1.msk.msra.mxu0 %vm1540_vm0, %v7281_v45  ;;  %3564 = vmatprep.mubr.f32.mxu0 %v7282_v12 }
 0xce4   : > { %4086 = vmatpush1.msk.msra.mxu1 %vm1540_vm0, %v7280_v33  ;;  %3635 = vmatprep.mubr.f32.mxu1 %v7282_v12 }
 0xce5   : > { %4983 = vmatprep.subr.bf16.mxu0 %v5828_v8  ;;  %5015 = vmatprep.subr.bf16.mxu1 %v5796_v16 }
 0xdb5   : > { %v4428_v2 = vpop.f32.mrb[32].mxu0  ;;  %v4463_v30 = vpop.f32.mrb[32].mxu1 }
 0xdb6   : > { %v4429_v20 = vpop.f32.mrb[33].mxu0  ;;  %v4464_v52 = vpop.f32.mrb[33].mxu1 }
 0xdb7   : > { %v4430_v13 = vadd.f32 %v4429_v20, %v4428_v2  ;;  %v4465_v47 = vadd.f32 %v4464_v52, %v4463_v30 }
 0xdb9   : > { %v3493_v62 = vadd.f32 %v4465_v47, %v4430_v13 }
 0xdbb   : > { %v3496_v63 = vmul.f32 0.00390625, %v3493_v62 }
 0xdbd   : > { %4084 = vmatmul.mubr.msk.f32.vlgmr.msra.gmra.mrb[34].mxu0 %vm714_vm2, %v3496_v63  ;;  %4087 = vmatmul.mubr.msk.f32.vlgmr.msra.gmra.mrb[34].mxu1 %vm714_vm2, %v3496_v63 }
 0xdbe   : > { %4985 = vmatpush3.bf16.msra.mxu0 %v5847_v51  ;;  %5017 = vmatpush3.bf16.msra.mxu1 %v5809_v11 }
 0xdbf   : > { %4987 = vmatprep.subr.bf16.mxu0 %v5858_v6  ;;  %5019 = vmatprep.subr.bf16.mxu1 %v5817_v25 }
 0xdc2   : > { %4989 = vmatpush3.bf16.msra.mxu0 %v7253_v10  ;;  %5021 = vmatpush3.bf16.msra.mxu1 %v5849_v7 }
 0xdc3   : > { %4991 = vmatprep.subr.bf16.mxu0 %v7255_v29  ;;  %5023 = vmatprep.subr.bf16.mxu1 %v7254_v56 }
 0xdc6   : > { %4993 = vmatpush3.bf16.msra.mxu0 %v7257_v44  ;;  %5025 = vmatpush3.bf16.msra.mxu1 %v7256_v48 }
 0xdc7   : > { %4995 = vmatprep.subr.bf16.mxu0 %v7259_v49  ;;  %5027 = vmatprep.subr.bf16.mxu1 %v7258_v59 }
 0xdca   : > { %4997 = vmatpush3.bf16.msra.mxu0 %v7261_v43  ;;  %5029 = vmatpush3.bf16.msra.mxu1 %v7260_v57 }
 0xdcb   : > { %4999 = vmatprep.subr.bf16.mxu0 %v7263_v60  ;;  %5031 = vmatprep.subr.bf16.mxu1 %v7262_v14 }
 0xdce   : > { %5001 = vmatpush3.bf16.msra.mxu0 %v7265_v46  ;;  %5033 = vmatpush3.bf16.msra.mxu1 %v7264_v28 }
 0xdcf   : > { %5003 = vmatprep.subr.bf16.mxu0 %v7267_v17  ;;  %5035 = vmatprep.subr.bf16.mxu1 %v7266_v15 }
 0xdd2   : > { %5005 = vmatpush3.bf16.msra.mxu0 %v7269_v0  ;;  %5037 = vmatpush3.bf16.msra.mxu1 %v7268_v42  ;;  %v3796_v42 = vpop.permute.xlu1 %3795 }
 0xdd3   : > { %5007 = vmatprep.subr.bf16.mxu0 %v7271_v38  ;;  %5039 = vmatprep.subr.bf16.mxu1 %v7270_v53 }
 0xdd6   : > { %5009 = vmatpush3.bf16.msra.mxu0 %v7273_v40  ;;  %5041 = vmatpush3.bf16.msra.mxu1 %v7272_v18 }
 0xdd7   : > { %5011 = vmatprep.subr.bf16.mxu0 %v7275_v34  ;;  %5043 = vmatprep.subr.bf16.mxu1 %v7274_v32 }
 0xdda   : > { %5013 = vmatpush3.bf16.msra.mxu0 %v7277_v4  ;;  %5045 = vmatpush3.bf16.msra.mxu1 %v7276_v61  ;;  %v3951_v61 = vpop.permute.xlu0 %3950 }
 0xddb   : > { %4088 = vmatprep.subr.msk.mxu0 %vm1540_vm0, %v7279_v58  ;;  %4091 = vmatprep.subr.msk.mxu1 %vm1540_vm0, %v7278_v31 }
 0xe90   : > { %v3566_v16 = vpop.f32.mrb[34].mxu0  ;;  %v3637_v11 = vpop.f32.mrb[34].mxu1 }
 0xe91   : > { %v3642_v25 = vsub.f32 %v3350_v26, %v3566_v16  ;;  %v3644_v8 = vsub.f32 %v3352_v9, %v3637_v11  ;;  %v3568_v51 = vpop.f32.mrb[35].mxu0  ;;  %v3639_v7 = vpop.f32.mrb[35].mxu1 }
 0xe92   : > { %v3643_v6 = vsub.f32 %v3351_v3, %v3568_v51  ;;  %v3645_v10 = vsub.f32 %v3353_v24, %v3639_v7 }
 0xe93   : > { %v3646_v48 = vmul.f32 %v3642_v25, %v3642_v25  ;;  %v3648_v44 = vmul.f32 %v3644_v8, %v3644_v8 }
 0xe94   : > { %v3647_v56 = vmul.f32 %v3643_v6, %v3643_v6  ;;  %v3649_v29 = vmul.f32 %v3645_v10, %v3645_v10 }
 0xe96   : > { %3714 = vmatprep.mubr.f32.mxu0 %v3647_v56  ;;  %3784 = vmatprep.mubr.f32.mxu1 %v3649_v29 }
 0xe97   : > { %3715 = vmatmul.mubr.f32.vlgmr.msra.gmra.mrb[36].mxu0 %v3646_v48  ;;  %3785 = vmatmul.mubr.f32.vlgmr.msra.gmra.mrb[36].mxu1 %v3648_v44 }
 0xe98   : > { %4089 = vmatpush1.msk.msra.mxu0 %vm1540_vm0, %v7281_v45  ;;  %3866 = vmatprep.mubr.f32.mxu0 %v7282_v12 }
 0xe99   : > { %4092 = vmatpush1.msk.msra.mxu1 %vm1540_vm0, %v7280_v33  ;;  %3937 = vmatprep.mubr.f32.mxu1 %v7282_v12 }
 0xf6a   : > { %v4498_v59 = vpop.f32.mrb[36].mxu0  ;;  %v4533_v49 = vpop.f32.mrb[36].mxu1 }
 0xf6b   : > { %v4499_v57 = vpop.f32.mrb[37].mxu0  ;;  %v4534_v43 = vpop.f32.mrb[37].mxu1 }
 0xf6c   : > { %v4500_v14 = vadd.f32 %v4499_v57, %v4498_v59  ;;  %v4535_v60 = vadd.f32 %v4534_v43, %v4533_v49 }
 0xf6e   : > { %v3787_v28 = vadd.f32 %v4535_v60, %v4500_v14 }
 0xf70   : > { %v3790_v46 = vmul.f32 0.00390625, %v3787_v28 }
 0xf72   : > { %v3791_v15 = vadd.f32 1e-05, %v3790_v46 }
 0xf74   : > { %5316 = vrsqrt.f32 %v3791_v15 }
 0xf7e   : > { %v5317_v17 = vpop.eup %5316 }
 0xf7f   : > { %v3798_v0 = vmul.f32 %v5317_v17, %v3796_v42 }
 0xf81   : > { %4090 = vmatmul.mubr.msk.f32.vlgmr.msra.gmra.mrb[38].mxu0 %vm714_vm2, %v3798_v0  ;;  %4093 = vmatmul.mubr.msk.f32.vlgmr.msra.gmra.mrb[38].mxu1 %vm714_vm2, %v3798_v0 }
0x1054   : > { %v3868_v53 = vpop.f32.mrb[38].mxu0  ;;  %v3939_v38 = vpop.f32.mrb[38].mxu1 }
0x1055   : > { %v3944_v18 = vmul.f32 %v3868_v53, %v3642_v25  ;;  %v3946_v40 = vmul.f32 %v3939_v38, %v3644_v8  ;;  %v3870_v32 = vpop.f32.mrb[39].mxu0  ;;  %v3941_v34 = vpop.f32.mrb[39].mxu1 }
0x1056   : > { %v3945_v4 = vmul.f32 %v3870_v32, %v3643_v6  ;;  %v3947_v31 = vmul.f32 %v3941_v34, %v3645_v10 }
0x1057   : > { %v3953_v58 = vadd.f32 %v3951_v61, %v3944_v18  ;;  %v3955_v45 = vadd.f32 %v3951_v61, %v3946_v40 }
0x1058   : > { %v3954_v33 = vadd.f32 %v3951_v61, %v3945_v4  ;;  %v3956_v12 = vadd.f32 %v3951_v61, %v3947_v31 }
0x1059   : > { %3957 = vst [vmem:[%s518_s5] sm:$0xff] %v3953_v58  ;;  %3959 = vst [vmem:[%s518_s5 + $0x10] sm:$0xff] %v3955_v45 }
0x105a   : > { %3958 = vst [vmem:[%s518_s5 + $0x8] sm:$0xff] %v3954_v33  ;;  %3960 = vst [vmem:[%s518_s5 + $0x18] sm:$0xff] %v3956_v12 }
0x105b PF: > { %s25_s17 = sadd.s32 1, %s5328_s17  }
0x105c   : > { %p22_p4 = scmp.ge.s32.totalorder %s25_s17, 4  }
0x105e   :  { %24 = sbr.rel (!%p22_p4) target bundleno = 1 (0x1), region = 113 }

</bundles_post_ra>
